<compile_context>
chip_gen: v7x
topology: tpu7x:2x2x1
jax: 0.10.0
libtpu: 0.0.40
codegen_flags: <defaults>
</compile_context>

<pallas_src>
import functools

import numpy as np
import jax
import jax.numpy as jnp
from jax import lax
from jax.experimental import pallas as pl
from jax.experimental.pallas import tpu as pltpu

_EPS = 1e-5


# --------------------------------------------------------------------------
# small helpers shared by the kernels
# --------------------------------------------------------------------------
def _stats(y):
    """Per-channel [sum, sum-of-squares] over the lane (pixel) axis: (C, 2)."""
    return jnp.concatenate(
        [jnp.sum(y, axis=1, keepdims=True),
         jnp.sum(y * y, axis=1, keepdims=True)], axis=1)


def _lane_shift(x, d):
    """out[:, p] = x[:, p + d] for 0 <= p + d < size, else 0 (static d)."""
    rows, size = x.shape
    if d == 0:
        return x
    if d > 0:
        pad = jnp.zeros((rows, d), x.dtype)
        return jnp.concatenate([x[:, d:], pad], axis=1)
    pad = jnp.zeros((rows, -d), x.dtype)
    return jnp.concatenate([pad, x[:, :size + d]], axis=1)


def _img_spec(shape):
    """Per-image block: grid index n selects the leading (image) block."""
    tail = (0,) * (len(shape) - 1)
    return pl.BlockSpec(shape, lambda n, t=tail: (n,) + t)


def _full_spec(shape):
    """Broadcast block: same full-array block for every grid step."""
    zero = (0,) * len(shape)
    return pl.BlockSpec(shape, lambda n, z=zero: z)


# --------------------------------------------------------------------------
# stage kernels (all gridded over images; tiles are (channels, pixels))
# --------------------------------------------------------------------------
def _make_stage1_fused(mm_dtype, Cb):
    # conv1 and conv4 share the same LHS (stride==1): one matmul, stacked rows.
    def kernel(x_ref, w_ref, y1_ref, s_ref, st_ref):
        x = x_ref[0].astype(mm_dtype)                                  # (Cin, HW)
        yy = jnp.dot(w_ref[...], x, preferred_element_type=jnp.float32)
        y1_ref[0] = yy[:Cb].astype(mm_dtype)
        s_ref[0] = yy[Cb:]
        st_ref[0] = _stats(yy)
    return kernel


def _make_stage1_split(mm_dtype):
    # stride > 1 with 1x1 shortcut: conv4 runs on the decimated input.
    def kernel(x_ref, xd_ref, w1_ref, w4_ref, y1_ref, s_ref, st1_ref, st4_ref):
        x = x_ref[0].astype(mm_dtype)
        y1 = jnp.dot(w1_ref[...], x, preferred_element_type=jnp.float32)
        y1_ref[0] = y1.astype(mm_dtype)
        st1_ref[0] = _stats(y1)
        xd = xd_ref[0].astype(mm_dtype)
        s = jnp.dot(w4_ref[...], xd, preferred_element_type=jnp.float32)
        s_ref[0] = s
        st4_ref[0] = _stats(s)
    return kernel


def _make_stage1_plain(mm_dtype):
    def kernel(x_ref, w1_ref, y1_ref, st1_ref):
        x = x_ref[0].astype(mm_dtype)
        y1 = jnp.dot(w1_ref[...], x, preferred_element_type=jnp.float32)
        y1_ref[0] = y1.astype(mm_dtype)
        st1_ref[0] = _stats(y1)
    return kernel


def _make_stage2(mm_dtype, Cb, H, W):
    HW = H * W

    def kernel(y1_ref, sc1_ref, w2_ref, m_ref, y2_ref, st_ref):
        # bn1 (precomputed scale/shift) + relu, in f32, then cast for the MXU.
        a = y1_ref[0].astype(jnp.float32) * sc1_ref[0] + sc1_ref[1]
        a = jnp.maximum(a, 0.0).astype(mm_dtype)                        # (Cb, HW)
        # grouped 3x3 conv = 9 accumulating K=Cb dots over lane-shifted taps.
        acc = jnp.dot(w2_ref[4], a, preferred_element_type=jnp.float32)
        for k in range(9):
            if k == 4:
                continue
            kh, kw = divmod(k, 3)
            d = (kh - 1) * W + (kw - 1)
            tap = _lane_shift(a, d) * m_ref[k]
            acc = acc + jnp.dot(w2_ref[k], tap,
                                preferred_element_type=jnp.float32)
        y2_ref[0] = acc.astype(mm_dtype)
        st_ref[0] = _stats(acc)
    return kernel


def _make_stage3(mm_dtype):
    def kernel(y2_ref, sc2_ref, w3_ref, y3_ref, st_ref):
        a = y2_ref[0].astype(jnp.float32) * sc2_ref[0] + sc2_ref[1]
        a = jnp.maximum(a, 0.0).astype(mm_dtype)
        y3 = jnp.dot(w3_ref[...], a, preferred_element_type=jnp.float32)
        y3_ref[0] = y3
        st_ref[0] = _stats(y3)
    return kernel


def _make_stage4(use_1x1conv):
    if use_1x1conv:
        def kernel(y3_ref, sc3_ref, s_ref, sc4_ref, out_ref):
            y = y3_ref[0] * sc3_ref[0] + sc3_ref[1]
            s = s_ref[0] * sc4_ref[0] + sc4_ref[1]
            out_ref[0] = jnp.maximum(y + s, 0.0)
    else:
        def kernel(y3_ref, sc3_ref, x_ref, out_ref):
            y = y3_ref[0] * sc3_ref[0] + sc3_ref[1]
            out_ref[0] = jnp.maximum(y + x_ref[0], 0.0)
    return kernel


# --------------------------------------------------------------------------
# wrapper-side (XLA) glue: weight prep, masks, BN finalize
# --------------------------------------------------------------------------
def _grouped_w2_dense(w2, Cb, conv_groups):
    """PyTorch grouped OIHW (Cb, Cpg, 3, 3) -> dense block-diag (9, Cb, Cb)."""
    cpg = Cb // conv_groups
    w = jnp.transpose(w2.astype(jnp.float32), (2, 3, 0, 1)).reshape(9, Cb, cpg)
    ci = jnp.arange(Cb)
    dense = w[:, :, ci % cpg]                                  # (9, out, in)
    same = (jnp.arange(Cb)[:, None] // cpg) == (ci[None, :] // cpg)
    return dense * same.astype(jnp.float32)[None]


def _conv2_masks(H, W, dtype):
    """0/1 validity masks (9, 1, H*W) for the 9 shifted taps (padding=1)."""
    pos = np.arange(H * W)
    hh, ww = pos // W, pos % W
    m = np.zeros((9, 1, H * W), np.float32)
    k = 0
    for kh in range(3):
        for kw in range(3):
            ok = ((hh + kh - 1 >= 0) & (hh + kh - 1 < H)
                  & (ww + kw - 1 >= 0) & (ww + kw - 1 < W))
            m[k, 0] = ok
            k += 1
    return jnp.asarray(m, dtype)


def _bn_scale_shift(stat_tot, count, gamma, beta):
    """(C,2) [sum, sumsq] totals -> packed (2, C, 1) [scale; shift] (f32)."""
    mean = stat_tot[:, 0] / count
    var = stat_tot[:, 1] / count - mean * mean
    scale = gamma.astype(jnp.float32) * lax.rsqrt(var + _EPS)
    shift = beta.astype(jnp.float32) - mean * scale
    return jnp.stack([scale, shift])[:, :, None]


# --------------------------------------------------------------------------
# public forward (NCHW in / NCHW out, exactly like the PyTorch module)
# --------------------------------------------------------------------------
def resnext_block_forward(x_nchw, params, *, groups, stride=1,
                          use_1x1conv=False, mm_dtype=jnp.bfloat16):
    x = x_nchw.astype(jnp.float32)
    N, Cin, H, W = x.shape
    Cb = params['w1'].shape[0]          # bottleneck channels
    C = params['w3'].shape[0]           # output channels
    conv_groups = Cb // groups          # groups of the 3x3 conv (PyTorch arg)
    Ho = (H - 1) // stride + 1
    Wo = (W - 1) // stride + 1
    HW, HWo = H * W, Ho * Wo

    if not use_1x1conv and (stride != 1 or Cin != C):
        raise ValueError("use_1x1conv=False requires stride==1 and Cin==C "
                         "(same as the PyTorch module's residual add).")

    cp = pltpu.CompilerParams(dimension_semantics=("parallel",),
                              vmem_limit_bytes=32 * 1024 * 1024)

    x3 = x.reshape(N, Cin, HW)                         # native NCHW, no transpose
    w1 = params['w1'][:, :, 0, 0].astype(mm_dtype)     # (Cb, Cin)
    w3m = params['w3'][:, :, 0, 0].astype(mm_dtype)    # (C, Cb)
    w2m = _grouped_w2_dense(params['w2'], Cb, conv_groups).astype(mm_dtype)
    masks = _conv2_masks(H, W, mm_dtype)

    # ---- stage 1: conv1 (+ conv4 shortcut), partial BN stats ----------------
    if use_1x1conv:
        w4 = params['w4'][:, :, 0, 0].astype(mm_dtype)   # (C, Cin)
        if stride == 1:
            w14 = jnp.concatenate([w1, w4], axis=0)      # shared-LHS fusion
            y1, s, st14 = pl.pallas_call(
                _make_stage1_fused(mm_dtype, Cb),
                grid=(N,),
                in_specs=[_img_spec((1, Cin, HW)), _full_spec((Cb + C, Cin))],
                out_specs=(_img_spec((1, Cb, HW)),
                           _img_spec((1, C, HW)),
                           _img_spec((1, Cb + C, 2))),
                out_shape=(jax.ShapeDtypeStruct((N, Cb, HW), mm_dtype),
                           jax.ShapeDtypeStruct((N, C, HW), jnp.float32),
                           jax.ShapeDtypeStruct((N, Cb + C, 2), jnp.float32)),
                compiler_params=cp,
            )(x3, w14)
            st1 = jnp.sum(st14[:, :Cb], axis=0)
            st4 = jnp.sum(st14[:, Cb:], axis=0)
        else:
            xdec = (x.reshape(N, Cin, H, W)[:, :, ::stride, ::stride]
                    .reshape(N, Cin, HWo))
            y1, s, st1p, st4p = pl.pallas_call(
                _make_stage1_split(mm_dtype),
                grid=(N,),
                in_specs=[_img_spec((1, Cin, HW)), _img_spec((1, Cin, HWo)),
                          _full_spec((Cb, Cin)), _full_spec((C, Cin))],
                out_specs=(_img_spec((1, Cb, HW)), _img_spec((1, C, HWo)),
                           _img_spec((1, Cb, 2)), _img_spec((1, C, 2))),
                out_shape=(jax.ShapeDtypeStruct((N, Cb, HW), mm_dtype),
                           jax.ShapeDtypeStruct((N, C, HWo), jnp.float32),
                           jax.ShapeDtypeStruct((N, Cb, 2), jnp.float32),
                           jax.ShapeDtypeStruct((N, C, 2), jnp.float32)),
                compiler_params=cp,
            )(x3, xdec, w1, w4)
            st1 = jnp.sum(st1p, axis=0)
            st4 = jnp.sum(st4p, axis=0)
    else:
        y1, st1p = pl.pallas_call(
            _make_stage1_plain(mm_dtype),
            grid=(N,),
            in_specs=[_img_spec((1, Cin, HW)), _full_spec((Cb, Cin))],
            out_specs=(_img_spec((1, Cb, HW)), _img_spec((1, Cb, 2))),
            out_shape=(jax.ShapeDtypeStruct((N, Cb, HW), mm_dtype),
                       jax.ShapeDtypeStruct((N, Cb, 2), jnp.float32)),
            compiler_params=cp,
        )(x3, w1)
        st1 = jnp.sum(st1p, axis=0)
        s, st4 = None, None

    sc1 = _bn_scale_shift(st1, float(N * HW), params['g1'], params['be1'])

    # ---- stage 2: bn1+relu, grouped 3x3 conv via 9 shifted-tap dots ---------
    y2f, st2p = pl.pallas_call(
        _make_stage2(mm_dtype, Cb, H, W),
        grid=(N,),
        in_specs=[_img_spec((1, Cb, HW)), _full_spec((2, Cb, 1)),
                  _full_spec((9, Cb, Cb)), _full_spec((9, 1, HW))],
        out_specs=(_img_spec((1, Cb, HW)), _img_spec((1, Cb, 2))),
        out_shape=(jax.ShapeDtypeStruct((N, Cb, HW), mm_dtype),
                   jax.ShapeDtypeStruct((N, Cb, 2), jnp.float32)),
        compiler_params=cp,
    )(y1, sc1, w2m, masks)

    if stride == 1:
        y2 = y2f
        st2 = jnp.sum(st2p, axis=0)
    else:
        y2 = (y2f.reshape(N, Cb, H, W)[:, :, ::stride, ::stride]
              .reshape(N, Cb, HWo))
        y2f32 = y2.astype(jnp.float32)
        st2 = jnp.stack([jnp.sum(y2f32, axis=(0, 2)),
                         jnp.sum(y2f32 * y2f32, axis=(0, 2))], axis=1)

    sc2 = _bn_scale_shift(st2, float(N * HWo), params['g2'], params['be2'])

    # ---- stage 3: bn2+relu, conv3 -------------------------------------------
    y3, st3p = pl.pallas_call(
        _make_stage3(mm_dtype),
        grid=(N,),
        in_specs=[_img_spec((1, Cb, HWo)), _full_spec((2, Cb, 1)),
                  _full_spec((C, Cb))],
        out_specs=(_img_spec((1, C, HWo)), _img_spec((1, C, 2))),
        out_shape=(jax.ShapeDtypeStruct((N, C, HWo), jnp.float32),
                   jax.ShapeDtypeStruct((N, C, 2), jnp.float32)),
        compiler_params=cp,
    )(y2, sc2, w3m)
    st3 = jnp.sum(st3p, axis=0)
    sc3 = _bn_scale_shift(st3, float(N * HWo), params['g3'], params['be3'])

    # ---- stage 4: bn3 (+ bn4) + residual add + relu --------------------------
    if use_1x1conv:
        sc4 = _bn_scale_shift(st4, float(N * HWo), params['g4'], params['be4'])
        out = pl.pallas_call(
            _make_stage4(True),
            grid=(N,),
            in_specs=[_img_spec((1, C, HWo)), _full_spec((2, C, 1)),
                      _img_spec((1, C, HWo)), _full_spec((2, C, 1))],
            out_specs=_img_spec((1, C, HWo)),
            out_shape=jax.ShapeDtypeStruct((N, C, HWo), jnp.float32),
            compiler_params=cp,
        )(y3, sc3, s, sc4)
    else:
        out = pl.pallas_call(
            _make_stage4(False),
            grid=(N,),
            in_specs=[_img_spec((1, C, HWo)), _full_spec((2, C, 1)),
                      _img_spec((1, C, HWo))],
            out_specs=_img_spec((1, C, HWo)),
            out_shape=jax.ShapeDtypeStruct((N, C, HWo), jnp.float32),
            compiler_params=cp,
        )(y3, sc3, x3)

    return out.reshape(N, C, Ho, Wo)


# --------------------------------------------------------------------------
# pure-JAX reference (HIGHEST precision)
# --------------------------------------------------------------------------
_PREC_REF = jax.lax.Precision.HIGHEST


def _bn_ref(y, gamma, beta):
    mean = jnp.mean(y, axis=(0, 2, 3), keepdims=True)
    var = jnp.mean(jnp.square(y - mean), axis=(0, 2, 3), keepdims=True)
    return ((y - mean) * jax.lax.rsqrt(var + _EPS) * gamma.reshape(1, -1, 1, 1)
            + beta.reshape(1, -1, 1, 1))


def _conv_ref(x, w, b, stride=1, padding=0, groups=1):
    y = jax.lax.conv_general_dilated(
        x, w, (stride, stride), ((padding, padding), (padding, padding)),
        feature_group_count=groups,
        dimension_numbers=('NCHW', 'OIHW', 'NCHW'), precision=_PREC_REF)
    return y + b.reshape(1, -1, 1, 1)


def resnext_block_reference(x, p, *, groups, stride=1, use_1x1conv=False):
    Cb = p['w1'].shape[0]
    Gc = Cb // groups
    y = jax.nn.relu(_bn_ref(_conv_ref(x, p['w1'], p['b1']), p['g1'], p['be1']))
    y = jax.nn.relu(_bn_ref(_conv_ref(y, p['w2'], p['b2'], stride=stride,
                                      padding=1, groups=Gc), p['g2'], p['be2']))
    y = _bn_ref(_conv_ref(y, p['w3'], p['b3']), p['g3'], p['be3'])
    if use_1x1conv:
        x = _bn_ref(_conv_ref(x, p['w4'], p['b4'], stride=stride),
                    p['g4'], p['be4'])
    return jax.nn.relu(y + x)


# --------------------------------------------------------------------------
# test harness
# --------------------------------------------------------------------------
def _make_params(key, Cin, num_channels, groups, bot_mul):
    Cb = int(round(num_channels * bot_mul))
    Gc = Cb // groups
    Cpg = Cb // Gc
    ks = jax.random.split(key, 16)

    def w(k, shape, fan_in):
        return jax.random.normal(k, shape, jnp.float32) / np.sqrt(fan_in)

    return {
        'w1': w(ks[0], (Cb, Cin, 1, 1), Cin),
        'b1': 0.1 * jax.random.normal(ks[1], (Cb,), jnp.float32),
        'w2': w(ks[2], (Cb, Cpg, 3, 3), Cpg * 9),
        'b2': 0.1 * jax.random.normal(ks[3], (Cb,), jnp.float32),
        'w3': w(ks[4], (num_channels, Cb, 1, 1), Cb),
        'b3': 0.1 * jax.random.normal(ks[5], (num_channels,), jnp.float32),
        'w4': w(ks[6], (num_channels, Cin, 1, 1), Cin),
        'b4': 0.1 * jax.random.normal(ks[7], (num_channels,), jnp.float32),
        'g1': 1.0 + 0.1 * jax.random.normal(ks[8], (Cb,), jnp.float32),
        'be1': 0.1 * jax.random.normal(ks[9], (Cb,), jnp.float32),
        'g2': 1.0 + 0.1 * jax.random.normal(ks[10], (Cb,), jnp.float32),
        'be2': 0.1 * jax.random.normal(ks[11], (Cb,), jnp.float32),
        'g3': 1.0 + 0.1 * jax.random.normal(ks[12], (num_channels,), jnp.float32),
        'be3': 0.1 * jax.random.normal(ks[13], (num_channels,), jnp.float32),
        'g4': 1.0 + 0.1 * jax.random.normal(ks[14], (num_channels,), jnp.float32),
        'be4': 0.1 * jax.random.normal(ks[15], (num_channels,), jnp.float32),
    }


def _check(name, key, *, Cin, num_channels, groups, bot_mul, stride,
           use_1x1conv, N=2, H=16, W=16, tol=5e-2):
    kp, kx = jax.random.split(key)
    params = _make_params(kp, Cin, num_channels, groups, bot_mul)
    x = jax.random.normal(kx, (N, Cin, H, W), jnp.float32)

    fwd = jax.jit(functools.partial(resnext_block_forward, groups=groups,
                                    stride=stride, use_1x1conv=use_1x1conv))
    out = jax.block_until_ready(fwd(x, params))
    ref = jax.block_until_ready(
        resnext_block_reference(x, params, groups=groups, stride=stride,
                                use_1x1conv=use_1x1conv))
    assert out.shape == ref.shape, (name, out.shape, ref.shape)
    # Tolerance covers bf16 matmul operands (f32 accumulation) through three
    # conv+BN stages; any structural bug produces O(1) errors.
    if not np.allclose(np.asarray(out), np.asarray(ref), atol=tol, rtol=tol):
        err = float(jnp.max(jnp.abs(out - ref)))
        raise AssertionError(f"{name}: mismatch vs reference, max abs err={err}")


if __name__ == "__main__":
    root = jax.random.PRNGKey(0)
    k1, k2, k3 = jax.random.split(root, 3)
    # ResNeXtBlock(32, groups=4, bot_mul=0.5, use_1x1conv=True, strides=1)
    _check("1x1conv_stride1", k1, Cin=16, num_channels=32, groups=4,
           bot_mul=0.5, stride=1, use_1x1conv=True)
    # downsampling variant: strides=2
    _check("1x1conv_stride2", k2, Cin=16, num_channels=32, groups=4,
           bot_mul=0.5, stride=2, use_1x1conv=True)
    # identity shortcut (requires Cin == num_channels, stride 1)
    _check("identity_stride1", k3, Cin=32, num_channels=32, groups=4,
           bot_mul=0.5, stride=1, use_1x1conv=False)
    print("KERNEL_OK")
</pallas_src>

<mosaic_0001>
module attributes {stable_mosaic.version = 11 : i64} {
  func.func @kernel(%arg0: i32, %arg1: memref<1x16x256xf32, #tpu.memory_space<vmem>>, %arg2: memref<48x16xbf16, #tpu.memory_space<vmem>>, %arg3: memref<1x16x256xbf16, #tpu.memory_space<vmem>>, %arg4: memref<1x32x256xf32, #tpu.memory_space<vmem>>, %arg5: memref<1x48x2xf32, #tpu.memory_space<vmem>>) attributes {dimension_semantics = [#tpu.dimension_semantics<parallel>], iteration_bounds = array<i64: 2>, scalar_prefetch = 0 : i64, scratch_operands = 0 : i64, tpu.core_type = #tpu.core_type<tc>, window_params = [{transform_indices = @transform_0, window_bounds = array<i64: 1, 16, 256>}, {pipeline_mode = #tpu.pipeline_mode<synchronous>, transform_indices = @transform_1, window_bounds = array<i64: 48, 16>}, {transform_indices = @transform_2, window_bounds = array<i64: 1, 16, 256>}, {transform_indices = @transform_3, window_bounds = array<i64: 1, 32, 256>}, {transform_indices = @transform_4, window_bounds = array<i64: 1, 48, 2>}]} {
    %c0 = arith.constant 0 : index
    %c0_0 = arith.constant 0 : index
    %c0_1 = arith.constant 0 : index
    %0 = vector.load %arg1[%c0, %c0_0, %c0_1] : memref<1x16x256xf32, #tpu.memory_space<vmem>>, vector<1x16x256xf32>
    %1 = vector.shape_cast %0 : vector<1x16x256xf32> to vector<16x256xf32>
    %2 = arith.truncf %1 : vector<16x256xf32> to vector<16x256xbf16>
    %c0_2 = arith.constant 0 : index
    %c0_3 = arith.constant 0 : index
    %3 = vector.load %arg2[%c0_2, %c0_3] : memref<48x16xbf16, #tpu.memory_space<vmem>>, vector<48x16xbf16>
    %cst = arith.constant dense<0.000000e+00> : vector<48x256xf32>
    %4 = tpu.matmul %3, %2, %cst {dimension_numbers = #tpu.dot_dimension_numbers<[1], [0], [0], [1], [0, 0, 1, 1], [], []>} : vector<48x16xbf16>, vector<16x256xbf16>, vector<48x256xf32> -> vector<48x256xf32>
    %5 = vector.extract_strided_slice %4 {offsets = [0, 0], sizes = [16, 256], strides = [1, 1]} : vector<48x256xf32> to vector<16x256xf32>
    %6 = arith.truncf %5 : vector<16x256xf32> to vector<16x256xbf16>
    %c0_4 = arith.constant 0 : index
    %c0_5 = arith.constant 0 : index
    %c0_6 = arith.constant 0 : index
    %7 = vector.load %arg3[%c0_4, %c0_5, %c0_6] : memref<1x16x256xbf16, #tpu.memory_space<vmem>>, vector<1x16x256xbf16>
    %8 = vector.shape_cast %7 : vector<1x16x256xbf16> to vector<16x256xbf16>
    %9 = vector.shape_cast %6 : vector<16x256xbf16> to vector<1x16x256xbf16>
    tpu.vector_store %arg3[%c0_4, %c0_5, %c0_6], %9 {strides = array<i32>} : memref<1x16x256xbf16, #tpu.memory_space<vmem>>, vector<1x16x256xbf16>,
    %10 = vector.extract_strided_slice %4 {offsets = [16, 0], sizes = [32, 256], strides = [1, 1]} : vector<48x256xf32> to vector<32x256xf32>
    %c0_7 = arith.constant 0 : index
    %c0_8 = arith.constant 0 : index
    %c0_9 = arith.constant 0 : index
    %11 = vector.load %arg4[%c0_7, %c0_8, %c0_9] : memref<1x32x256xf32, #tpu.memory_space<vmem>>, vector<1x32x256xf32>
    %12 = vector.shape_cast %11 : vector<1x32x256xf32> to vector<32x256xf32>
    %13 = vector.shape_cast %10 : vector<32x256xf32> to vector<1x32x256xf32>
    tpu.vector_store %arg4[%c0_7, %c0_8, %c0_9], %13 {strides = array<i32>} : memref<1x32x256xf32, #tpu.memory_space<vmem>>, vector<1x32x256xf32>,
    %cst_10 = arith.constant dense<0.000000e+00> : vector<48xf32>
    %14 = vector.multi_reduction <add>, %4, %cst_10 [1] : vector<48x256xf32> to vector<48xf32>
    %15 = vector.shape_cast %14 : vector<48xf32> to vector<48x1xf32>
    %16 = arith.mulf %4, %4 : vector<48x256xf32>
    %cst_11 = arith.constant dense<0.000000e+00> : vector<48xf32>
    %17 = vector.multi_reduction <add>, %16, %cst_11 [1] : vector<48x256xf32> to vector<48xf32>
    %18 = vector.shape_cast %17 : vector<48xf32> to vector<48x1xf32>
    %19 = tpu.concatenate %15, %18 in 1 : vector<48x1xf32>, vector<48x1xf32> -> vector<48x2xf32>
    %c0_12 = arith.constant 0 : index
    %c0_13 = arith.constant 0 : index
    %c0_14 = arith.constant 0 : index
    %20 = vector.load %arg5[%c0_12, %c0_13, %c0_14] : memref<1x48x2xf32, #tpu.memory_space<vmem>>, vector<1x48x2xf32>
    %21 = vector.shape_cast %20 : vector<1x48x2xf32> to vector<48x2xf32>
    %22 = vector.shape_cast %19 : vector<48x2xf32> to vector<1x48x2xf32>
    tpu.vector_store %arg5[%c0_12, %c0_13, %c0_14], %22 {strides = array<i32>} : memref<1x48x2xf32, #tpu.memory_space<vmem>>, vector<1x48x2xf32>,
    return
  }
  func.func @transform_0(%arg0: i32) -> (i32, i32, i32) {
    %c0_i32 = arith.constant 0 : i32
    %c0_i32_0 = arith.constant 0 : i32
    %c0_i32_1 = arith.constant 0 : i32
    return %arg0, %c0_i32, %c0_i32_0 : i32, i32, i32
  }
  func.func @transform_1(%arg0: i32) -> (i32, i32) {
    %c0_i32 = arith.constant 0 : i32
    %c0_i32_0 = arith.constant 0 : i32
    %c0_i32_1 = arith.constant 0 : i32
    return %c0_i32, %c0_i32_0 : i32, i32
  }
  func.func @transform_2(%arg0: i32) -> (i32, i32, i32) {
    %c0_i32 = arith.constant 0 : i32
    %c0_i32_0 = arith.constant 0 : i32
    %c0_i32_1 = arith.constant 0 : i32
    return %arg0, %c0_i32, %c0_i32_0 : i32, i32, i32
  }
  func.func @transform_3(%arg0: i32) -> (i32, i32, i32) {
    %c0_i32 = arith.constant 0 : i32
    %c0_i32_0 = arith.constant 0 : i32
    %c0_i32_1 = arith.constant 0 : i32
    return %arg0, %c0_i32, %c0_i32_0 : i32, i32, i32
  }
  func.func @transform_4(%arg0: i32) -> (i32, i32, i32) {
    %c0_i32 = arith.constant 0 : i32
    %c0_i32_0 = arith.constant 0 : i32
    %c0_i32_1 = arith.constant 0 : i32
    return %arg0, %c0_i32, %c0_i32_0 : i32, i32, i32
  }
}

module attributes {stable_mosaic.version = 11 : i64} {
  func.func @kernel(%arg0: i32, %arg1: memref<1x16x256xbf16, #tpu.memory_space<vmem>>, %arg2: memref<2x16x1xf32, #tpu.memory_space<vmem>>, %arg3: memref<9x16x16xbf16, #tpu.memory_space<vmem>>, %arg4: memref<9x1x256xbf16, #tpu.memory_space<vmem>>, %arg5: memref<1x16x256xbf16, #tpu.memory_space<vmem>>, %arg6: memref<1x16x2xf32, #tpu.memory_space<vmem>>) attributes {dimension_semantics = [#tpu.dimension_semantics<parallel>], iteration_bounds = array<i64: 2>, scalar_prefetch = 0 : i64, scratch_operands = 0 : i64, tpu.core_type = #tpu.core_type<tc>, window_params = [{transform_indices = @transform_0, window_bounds = array<i64: 1, 16, 256>}, {pipeline_mode = #tpu.pipeline_mode<synchronous>, transform_indices = @transform_1, window_bounds = array<i64: 2, 16, 1>}, {pipeline_mode = #tpu.pipeline_mode<synchronous>, transform_indices = @transform_2, window_bounds = array<i64: 9, 16, 16>}, {pipeline_mode = #tpu.pipeline_mode<synchronous>, transform_indices = @transform_3, window_bounds = array<i64: 9, 1, 256>}, {transform_indices = @transform_4, window_bounds = array<i64: 1, 16, 256>}, {transform_indices = @transform_5, window_bounds = array<i64: 1, 16, 2>}]} {
    %c0 = arith.constant 0 : index
    %c0_0 = arith.constant 0 : index
    %c0_1 = arith.constant 0 : index
    %0 = vector.load %arg1[%c0, %c0_0, %c0_1] : memref<1x16x256xbf16, #tpu.memory_space<vmem>>, vector<1x16x256xbf16>
    %1 = vector.shape_cast %0 : vector<1x16x256xbf16> to vector<16x256xbf16>
    %2 = arith.extf %1 : vector<16x256xbf16> to vector<16x256xf32>
    %c0_2 = arith.constant 0 : index
    %c0_3 = arith.constant 0 : index
    %c0_4 = arith.constant 0 : index
    %3 = vector.load %arg2[%c0_2, %c0_3, %c0_4] : memref<2x16x1xf32, #tpu.memory_space<vmem>>, vector<1x16x1xf32>
    %4 = vector.shape_cast %3 : vector<1x16x1xf32> to vector<16x1xf32>
    %5 = vector.broadcast %4 : vector<16x1xf32> to vector<16x256xf32>
    %6 = arith.mulf %2, %5 : vector<16x256xf32>
    %c1 = arith.constant 1 : index
    %c0_5 = arith.constant 0 : index
    %c0_6 = arith.constant 0 : index
    %7 = vector.load %arg2[%c1, %c0_5, %c0_6] : memref<2x16x1xf32, #tpu.memory_space<vmem>>, vector<1x16x1xf32>
    %8 = vector.shape_cast %7 : vector<1x16x1xf32> to vector<16x1xf32>
    %9 = vector.broadcast %8 : vector<16x1xf32> to vector<16x256xf32>
    %10 = arith.addf %6, %9 : vector<16x256xf32>
    %cst = arith.constant 0.000000e+00 : f32
    %11 = vector.broadcast %cst : f32 to vector<16x256xf32>
    %12 = arith.maximumf %10, %11 : vector<16x256xf32>
    %13 = arith.truncf %12 : vector<16x256xf32> to vector<16x256xbf16>
    %c4 = arith.constant 4 : index
    %c0_7 = arith.constant 0 : index
    %c0_8 = arith.constant 0 : index
    %14 = vector.load %arg3[%c4, %c0_7, %c0_8] : memref<9x16x16xbf16, #tpu.memory_space<vmem>>, vector<1x16x16xbf16>
    %15 = vector.shape_cast %14 : vector<1x16x16xbf16> to vector<16x16xbf16>
    %cst_9 = arith.constant dense<0.000000e+00> : vector<16x256xf32>
    %16 = tpu.matmul %15, %13, %cst_9 {dimension_numbers = #tpu.dot_dimension_numbers<[1], [0], [0], [1], [0, 0, 1, 1], [], []>} : vector<16x16xbf16>, vector<16x256xbf16>, vector<16x256xf32> -> vector<16x256xf32>
    %cst_10 = arith.constant 0.000000e+00 : bf16
    %17 = vector.broadcast %cst_10 : bf16 to vector<16x17xbf16>
    %18 = vector.extract_strided_slice %13 {offsets = [0, 0], sizes = [16, 239], strides = [1, 1]} : vector<16x256xbf16> to vector<16x239xbf16>
    %19 = tpu.concatenate %17, %18 in 1 : vector<16x17xbf16>, vector<16x239xbf16> -> vector<16x256xbf16>
    %c0_11 = arith.constant 0 : index
    %c0_12 = arith.constant 0 : index
    %c0_13 = arith.constant 0 : index
    %20 = vector.load %arg4[%c0_11, %c0_12, %c0_13] : memref<9x1x256xbf16, #tpu.memory_space<vmem>>, vector<1x1x256xbf16>
    %21 = vector.shape_cast %20 : vector<1x1x256xbf16> to vector<1x256xbf16>
    %22 = vector.broadcast %21 : vector<1x256xbf16> to vector<16x256xbf16>
    %23 = arith.mulf %19, %22 : vector<16x256xbf16>
    %c0_14 = arith.constant 0 : index
    %c0_15 = arith.constant 0 : index
    %c0_16 = arith.constant 0 : index
    %24 = vector.load %arg3[%c0_14, %c0_15, %c0_16] : memref<9x16x16xbf16, #tpu.memory_space<vmem>>, vector<1x16x16xbf16>
    %25 = vector.shape_cast %24 : vector<1x16x16xbf16> to vector<16x16xbf16>
    %cst_17 = arith.constant dense<0.000000e+00> : vector<16x256xf32>
    %26 = tpu.matmul %25, %23, %cst_17 {dimension_numbers = #tpu.dot_dimension_numbers<[1], [0], [0], [1], [0, 0, 1, 1], [], []>} : vector<16x16xbf16>, vector<16x256xbf16>, vector<16x256xf32> -> vector<16x256xf32>
    %27 = arith.addf %16, %26 : vector<16x256xf32>
    %cst_18 = arith.constant 0.000000e+00 : bf16
    %28 = vector.broadcast %cst_18 : bf16 to vector<16x16xbf16>
    %29 = vector.extract_strided_slice %13 {offsets = [0, 0], sizes = [16, 240], strides = [1, 1]} : vector<16x256xbf16> to vector<16x240xbf16>
    %30 = tpu.concatenate %28, %29 in 1 : vector<16x16xbf16>, vector<16x240xbf16> -> vector<16x256xbf16>
    %c1_19 = arith.constant 1 : index
    %c0_20 = arith.constant 0 : index
    %c0_21 = arith.constant 0 : index
    %31 = vector.load %arg4[%c1_19, %c0_20, %c0_21] : memref<9x1x256xbf16, #tpu.memory_space<vmem>>, vector<1x1x256xbf16>
    %32 = vector.shape_cast %31 : vector<1x1x256xbf16> to vector<1x256xbf16>
    %33 = vector.broadcast %32 : vector<1x256xbf16> to vector<16x256xbf16>
    %34 = arith.mulf %30, %33 : vector<16x256xbf16>
    %c1_22 = arith.constant 1 : index
    %c0_23 = arith.constant 0 : index
    %c0_24 = arith.constant 0 : index
    %35 = vector.load %arg3[%c1_22, %c0_23, %c0_24] : memref<9x16x16xbf16, #tpu.memory_space<vmem>>, vector<1x16x16xbf16>
    %36 = vector.shape_cast %35 : vector<1x16x16xbf16> to vector<16x16xbf16>
    %cst_25 = arith.constant dense<0.000000e+00> : vector<16x256xf32>
    %37 = tpu.matmul %36, %34, %cst_25 {dimension_numbers = #tpu.dot_dimension_numbers<[1], [0], [0], [1], [0, 0, 1, 1], [], []>} : vector<16x16xbf16>, vector<16x256xbf16>, vector<16x256xf32> -> vector<16x256xf32>
    %38 = arith.addf %27, %37 : vector<16x256xf32>
    %cst_26 = arith.constant 0.000000e+00 : bf16
    %39 = vector.broadcast %cst_26 : bf16 to vector<16x15xbf16>
    %40 = vector.extract_strided_slice %13 {offsets = [0, 0], sizes = [16, 241], strides = [1, 1]} : vector<16x256xbf16> to vector<16x241xbf16>
    %41 = tpu.concatenate %39, %40 in 1 : vector<16x15xbf16>, vector<16x241xbf16> -> vector<16x256xbf16>
    %c2 = arith.constant 2 : index
    %c0_27 = arith.constant 0 : index
    %c0_28 = arith.constant 0 : index
    %42 = vector.load %arg4[%c2, %c0_27, %c0_28] : memref<9x1x256xbf16, #tpu.memory_space<vmem>>, vector<1x1x256xbf16>
    %43 = vector.shape_cast %42 : vector<1x1x256xbf16> to vector<1x256xbf16>
    %44 = vector.broadcast %43 : vector<1x256xbf16> to vector<16x256xbf16>
    %45 = arith.mulf %41, %44 : vector<16x256xbf16>
    %c2_29 = arith.constant 2 : index
    %c0_30 = arith.constant 0 : index
    %c0_31 = arith.constant 0 : index
    %46 = vector.load %arg3[%c2_29, %c0_30, %c0_31] : memref<9x16x16xbf16, #tpu.memory_space<vmem>>, vector<1x16x16xbf16>
    %47 = vector.shape_cast %46 : vector<1x16x16xbf16> to vector<16x16xbf16>
    %cst_32 = arith.constant dense<0.000000e+00> : vector<16x256xf32>
    %48 = tpu.matmul %47, %45, %cst_32 {dimension_numbers = #tpu.dot_dimension_numbers<[1], [0], [0], [1], [0, 0, 1, 1], [], []>} : vector<16x16xbf16>, vector<16x256xbf16>, vector<16x256xf32> -> vector<16x256xf32>
    %49 = arith.addf %38, %48 : vector<16x256xf32>
    %cst_33 = arith.constant 0.000000e+00 : bf16
    %50 = vector.broadcast %cst_33 : bf16 to vector<16x1xbf16>
    %51 = vector.extract_strided_slice %13 {offsets = [0, 0], sizes = [16, 255], strides = [1, 1]} : vector<16x256xbf16> to vector<16x255xbf16>
    %52 = tpu.concatenate %50, %51 in 1 : vector<16x1xbf16>, vector<16x255xbf16> -> vector<16x256xbf16>
    %c3 = arith.constant 3 : index
    %c0_34 = arith.constant 0 : index
    %c0_35 = arith.constant 0 : index
    %53 = vector.load %arg4[%c3, %c0_34, %c0_35] : memref<9x1x256xbf16, #tpu.memory_space<vmem>>, vector<1x1x256xbf16>
    %54 = vector.shape_cast %53 : vector<1x1x256xbf16> to vector<1x256xbf16>
    %55 = vector.broadcast %54 : vector<1x256xbf16> to vector<16x256xbf16>
    %56 = arith.mulf %52, %55 : vector<16x256xbf16>
    %c3_36 = arith.constant 3 : index
    %c0_37 = arith.constant 0 : index
    %c0_38 = arith.constant 0 : index
    %57 = vector.load %arg3[%c3_36, %c0_37, %c0_38] : memref<9x16x16xbf16, #tpu.memory_space<vmem>>, vector<1x16x16xbf16>
    %58 = vector.shape_cast %57 : vector<1x16x16xbf16> to vector<16x16xbf16>
    %cst_39 = arith.constant dense<0.000000e+00> : vector<16x256xf32>
    %59 = tpu.matmul %58, %56, %cst_39 {dimension_numbers = #tpu.dot_dimension_numbers<[1], [0], [0], [1], [0, 0, 1, 1], [], []>} : vector<16x16xbf16>, vector<16x256xbf16>, vector<16x256xf32> -> vector<16x256xf32>
    %60 = arith.addf %49, %59 : vector<16x256xf32>
    %cst_40 = arith.constant 0.000000e+00 : bf16
    %61 = vector.broadcast %cst_40 : bf16 to vector<16x1xbf16>
    %62 = vector.extract_strided_slice %13 {offsets = [0, 1], sizes = [16, 255], strides = [1, 1]} : vector<16x256xbf16> to vector<16x255xbf16>
    %63 = tpu.concatenate %62, %61 in 1 : vector<16x255xbf16>, vector<16x1xbf16> -> vector<16x256xbf16>
    %c5 = arith.constant 5 : index
    %c0_41 = arith.constant 0 : index
    %c0_42 = arith.constant 0 : index
    %64 = vector.load %arg4[%c5, %c0_41, %c0_42] : memref<9x1x256xbf16, #tpu.memory_space<vmem>>, vector<1x1x256xbf16>
    %65 = vector.shape_cast %64 : vector<1x1x256xbf16> to vector<1x256xbf16>
    %66 = vector.broadcast %65 : vector<1x256xbf16> to vector<16x256xbf16>
    %67 = arith.mulf %63, %66 : vector<16x256xbf16>
    %c5_43 = arith.constant 5 : index
    %c0_44 = arith.constant 0 : index
    %c0_45 = arith.constant 0 : index
    %68 = vector.load %arg3[%c5_43, %c0_44, %c0_45] : memref<9x16x16xbf16, #tpu.memory_space<vmem>>, vector<1x16x16xbf16>
    %69 = vector.shape_cast %68 : vector<1x16x16xbf16> to vector<16x16xbf16>
    %cst_46 = arith.constant dense<0.000000e+00> : vector<16x256xf32>
    %70 = tpu.matmul %69, %67, %cst_46 {dimension_numbers = #tpu.dot_dimension_numbers<[1], [0], [0], [1], [0, 0, 1, 1], [], []>} : vector<16x16xbf16>, vector<16x256xbf16>, vector<16x256xf32> -> vector<16x256xf32>
    %71 = arith.addf %60, %70 : vector<16x256xf32>
    %cst_47 = arith.constant 0.000000e+00 : bf16
    %72 = vector.broadcast %cst_47 : bf16 to vector<16x15xbf16>
    %73 = vector.extract_strided_slice %13 {offsets = [0, 15], sizes = [16, 241], strides = [1, 1]} : vector<16x256xbf16> to vector<16x241xbf16>
    %74 = tpu.concatenate %73, %72 in 1 : vector<16x241xbf16>, vector<16x15xbf16> -> vector<16x256xbf16>
    %c6 = arith.constant 6 : index
    %c0_48 = arith.constant 0 : index
    %c0_49 = arith.constant 0 : index
    %75 = vector.load %arg4[%c6, %c0_48, %c0_49] : memref<9x1x256xbf16, #tpu.memory_space<vmem>>, vector<1x1x256xbf16>
    %76 = vector.shape_cast %75 : vector<1x1x256xbf16> to vector<1x256xbf16>
    %77 = vector.broadcast %76 : vector<1x256xbf16> to vector<16x256xbf16>
    %78 = arith.mulf %74, %77 : vector<16x256xbf16>
    %c6_50 = arith.constant 6 : index
    %c0_51 = arith.constant 0 : index
    %c0_52 = arith.constant 0 : index
    %79 = vector.load %arg3[%c6_50, %c0_51, %c0_52] : memref<9x16x16xbf16, #tpu.memory_space<vmem>>, vector<1x16x16xbf16>
    %80 = vector.shape_cast %79 : vector<1x16x16xbf16> to vector<16x16xbf16>
    %cst_53 = arith.constant dense<0.000000e+00> : vector<16x256xf32>
    %81 = tpu.matmul %80, %78, %cst_53 {dimension_numbers = #tpu.dot_dimension_numbers<[1], [0], [0], [1], [0, 0, 1, 1], [], []>} : vector<16x16xbf16>, vector<16x256xbf16>, vector<16x256xf32> -> vector<16x256xf32>
    %82 = arith.addf %71, %81 : vector<16x256xf32>
    %cst_54 = arith.constant 0.000000e+00 : bf16
    %83 = vector.broadcast %cst_54 : bf16 to vector<16x16xbf16>
    %84 = vector.extract_strided_slice %13 {offsets = [0, 16], sizes = [16, 240], strides = [1, 1]} : vector<16x256xbf16> to vector<16x240xbf16>
    %85 = tpu.concatenate %84, %83 in 1 : vector<16x240xbf16>, vector<16x16xbf16> -> vector<16x256xbf16>
    %c7 = arith.constant 7 : index
    %c0_55 = arith.constant 0 : index
    %c0_56 = arith.constant 0 : index
    %86 = vector.load %arg4[%c7, %c0_55, %c0_56] : memref<9x1x256xbf16, #tpu.memory_space<vmem>>, vector<1x1x256xbf16>
    %87 = vector.shape_cast %86 : vector<1x1x256xbf16> to vector<1x256xbf16>
    %88 = vector.broadcast %87 : vector<1x256xbf16> to vector<16x256xbf16>
    %89 = arith.mulf %85, %88 : vector<16x256xbf16>
    %c7_57 = arith.constant 7 : index
    %c0_58 = arith.constant 0 : index
    %c0_59 = arith.constant 0 : index
    %90 = vector.load %arg3[%c7_57, %c0_58, %c0_59] : memref<9x16x16xbf16, #tpu.memory_space<vmem>>, vector<1x16x16xbf16>
    %91 = vector.shape_cast %90 : vector<1x16x16xbf16> to vector<16x16xbf16>
    %cst_60 = arith.constant dense<0.000000e+00> : vector<16x256xf32>
    %92 = tpu.matmul %91, %89, %cst_60 {dimension_numbers = #tpu.dot_dimension_numbers<[1], [0], [0], [1], [0, 0, 1, 1], [], []>} : vector<16x16xbf16>, vector<16x256xbf16>, vector<16x256xf32> -> vector<16x256xf32>
    %93 = arith.addf %82, %92 : vector<16x256xf32>
    %cst_61 = arith.constant 0.000000e+00 : bf16
    %94 = vector.broadcast %cst_61 : bf16 to vector<16x17xbf16>
    %95 = vector.extract_strided_slice %13 {offsets = [0, 17], sizes = [16, 239], strides = [1, 1]} : vector<16x256xbf16> to vector<16x239xbf16>
    %96 = tpu.concatenate %95, %94 in 1 : vector<16x239xbf16>, vector<16x17xbf16> -> vector<16x256xbf16>
    %c8 = arith.constant 8 : index
    %c0_62 = arith.constant 0 : index
    %c0_63 = arith.constant 0 : index
    %97 = vector.load %arg4[%c8, %c0_62, %c0_63] : memref<9x1x256xbf16, #tpu.memory_space<vmem>>, vector<1x1x256xbf16>
    %98 = vector.shape_cast %97 : vector<1x1x256xbf16> to vector<1x256xbf16>
    %99 = vector.broadcast %98 : vector<1x256xbf16> to vector<16x256xbf16>
    %100 = arith.mulf %96, %99 : vector<16x256xbf16>
    %c8_64 = arith.constant 8 : index
    %c0_65 = arith.constant 0 : index
    %c0_66 = arith.constant 0 : index
    %101 = vector.load %arg3[%c8_64, %c0_65, %c0_66] : memref<9x16x16xbf16, #tpu.memory_space<vmem>>, vector<1x16x16xbf16>
    %102 = vector.shape_cast %101 : vector<1x16x16xbf16> to vector<16x16xbf16>
    %cst_67 = arith.constant dense<0.000000e+00> : vector<16x256xf32>
    %103 = tpu.matmul %102, %100, %cst_67 {dimension_numbers = #tpu.dot_dimension_numbers<[1], [0], [0], [1], [0, 0, 1, 1], [], []>} : vector<16x16xbf16>, vector<16x256xbf16>, vector<16x256xf32> -> vector<16x256xf32>
    %104 = arith.addf %93, %103 : vector<16x256xf32>
    %105 = arith.truncf %104 : vector<16x256xf32> to vector<16x256xbf16>
    %c0_68 = arith.constant 0 : index
    %c0_69 = arith.constant 0 : index
    %c0_70 = arith.constant 0 : index
    %106 = vector.load %arg5[%c0_68, %c0_69, %c0_70] : memref<1x16x256xbf16, #tpu.memory_space<vmem>>, vector<1x16x256xbf16>
    %107 = vector.shape_cast %106 : vector<1x16x256xbf16> to vector<16x256xbf16>
    %108 = vector.shape_cast %105 : vector<16x256xbf16> to vector<1x16x256xbf16>
    tpu.vector_store %arg5[%c0_68, %c0_69, %c0_70], %108 {strides = array<i32>} : memref<1x16x256xbf16, #tpu.memory_space<vmem>>, vector<1x16x256xbf16>,
    %cst_71 = arith.constant dense<0.000000e+00> : vector<16xf32>
    %109 = vector.multi_reduction <add>, %104, %cst_71 [1] : vector<16x256xf32> to vector<16xf32>
    %110 = vector.shape_cast %109 : vector<16xf32> to vector<16x1xf32>
    %111 = arith.mulf %104, %104 : vector<16x256xf32>
    %cst_72 = arith.constant dense<0.000000e+00> : vector<16xf32>
    %112 = vector.multi_reduction <add>, %111, %cst_72 [1] : vector<16x256xf32> to vector<16xf32>
    %113 = vector.shape_cast %112 : vector<16xf32> to vector<16x1xf32>
    %114 = tpu.concatenate %110, %113 in 1 : vector<16x1xf32>, vector<16x1xf32> -> vector<16x2xf32>
    %c0_73 = arith.constant 0 : index
    %c0_74 = arith.constant 0 : index
    %c0_75 = arith.constant 0 : index
    %115 = vector.load %arg6[%c0_73, %c0_74, %c0_75] : memref<1x16x2xf32, #tpu.memory_space<vmem>>, vector<1x16x2xf32>
    %116 = vector.shape_cast %115 : vector<1x16x2xf32> to vector<16x2xf32>
    %117 = vector.shape_cast %114 : vector<16x2xf32> to vector<1x16x2xf32>
    tpu.vector_store %arg6[%c0_73, %c0_74, %c0_75], %117 {strides = array<i32>} : memref<1x16x2xf32, #tpu.memory_space<vmem>>, vector<1x16x2xf32>,
    return
  }
  func.func @transform_0(%arg0: i32) -> (i32, i32, i32) {
    %c0_i32 = arith.constant 0 : i32
    %c0_i32_0 = arith.constant 0 : i32
    %c0_i32_1 = arith.constant 0 : i32
    return %arg0, %c0_i32, %c0_i32_0 : i32, i32, i32
  }
  func.func @transform_1(%arg0: i32) -> (i32, i32, i32) {
    %c0_i32 = arith.constant 0 : i32
    %c0_i32_0 = arith.constant 0 : i32
    %c0_i32_1 = arith.constant 0 : i32
    %c0_i32_2 = arith.constant 0 : i32
    return %c0_i32, %c0_i32_0, %c0_i32_1 : i32, i32, i32
  }
  func.func @transform_2(%arg0: i32) -> (i32, i32, i32) {
    %c0_i32 = arith.constant 0 : i32
    %c0_i32_0 = arith.constant 0 : i32
    %c0_i32_1 = arith.constant 0 : i32
    %c0_i32_2 = arith.constant 0 : i32
    return %c0_i32, %c0_i32_0, %c0_i32_1 : i32, i32, i32
  }
  func.func @transform_3(%arg0: i32) -> (i32, i32, i32) {
    %c0_i32 = arith.constant 0 : i32
    %c0_i32_0 = arith.constant 0 : i32
    %c0_i32_1 = arith.constant 0 : i32
    %c0_i32_2 = arith.constant 0 : i32
    return %c0_i32, %c0_i32_0, %c0_i32_1 : i32, i32, i32
  }
  func.func @transform_4(%arg0: i32) -> (i32, i32, i32) {
    %c0_i32 = arith.constant 0 : i32
    %c0_i32_0 = arith.constant 0 : i32
    %c0_i32_1 = arith.constant 0 : i32
    return %arg0, %c0_i32, %c0_i32_0 : i32, i32, i32
  }
  func.func @transform_5(%arg0: i32) -> (i32, i32, i32) {
    %c0_i32 = arith.constant 0 : i32
    %c0_i32_0 = arith.constant 0 : i32
    %c0_i32_1 = arith.constant 0 : i32
    return %arg0, %c0_i32, %c0_i32_0 : i32, i32, i32
  }
}

module attributes {stable_mosaic.version = 11 : i64} {
  func.func @kernel(%arg0: i32, %arg1: memref<1x16x256xbf16, #tpu.memory_space<vmem>>, %arg2: memref<2x16x1xf32, #tpu.memory_space<vmem>>, %arg3: memref<32x16xbf16, #tpu.memory_space<vmem>>, %arg4: memref<1x32x256xf32, #tpu.memory_space<vmem>>, %arg5: memref<1x32x2xf32, #tpu.memory_space<vmem>>) attributes {dimension_semantics = [#tpu.dimension_semantics<parallel>], iteration_bounds = array<i64: 2>, scalar_prefetch = 0 : i64, scratch_operands = 0 : i64, tpu.core_type = #tpu.core_type<tc>, window_params = [{transform_indices = @transform_0, window_bounds = array<i64: 1, 16, 256>}, {pipeline_mode = #tpu.pipeline_mode<synchronous>, transform_indices = @transform_1, window_bounds = array<i64: 2, 16, 1>}, {pipeline_mode = #tpu.pipeline_mode<synchronous>, transform_indices = @transform_2, window_bounds = array<i64: 32, 16>}, {transform_indices = @transform_3, window_bounds = array<i64: 1, 32, 256>}, {transform_indices = @transform_4, window_bounds = array<i64: 1, 32, 2>}]} {
    %c0 = arith.constant 0 : index
    %c0_0 = arith.constant 0 : index
    %c0_1 = arith.constant 0 : index
    %0 = vector.load %arg1[%c0, %c0_0, %c0_1] : memref<1x16x256xbf16, #tpu.memory_space<vmem>>, vector<1x16x256xbf16>
    %1 = vector.shape_cast %0 : vector<1x16x256xbf16> to vector<16x256xbf16>
    %2 = arith.extf %1 : vector<16x256xbf16> to vector<16x256xf32>
    %c0_2 = arith.constant 0 : index
    %c0_3 = arith.constant 0 : index
    %c0_4 = arith.constant 0 : index
    %3 = vector.load %arg2[%c0_2, %c0_3, %c0_4] : memref<2x16x1xf32, #tpu.memory_space<vmem>>, vector<1x16x1xf32>
    %4 = vector.shape_cast %3 : vector<1x16x1xf32> to vector<16x1xf32>
    %5 = vector.broadcast %4 : vector<16x1xf32> to vector<16x256xf32>
    %6 = arith.mulf %2, %5 : vector<16x256xf32>
    %c1 = arith.constant 1 : index
    %c0_5 = arith.constant 0 : index
    %c0_6 = arith.constant 0 : index
    %7 = vector.load %arg2[%c1, %c0_5, %c0_6] : memref<2x16x1xf32, #tpu.memory_space<vmem>>, vector<1x16x1xf32>
    %8 = vector.shape_cast %7 : vector<1x16x1xf32> to vector<16x1xf32>
    %9 = vector.broadcast %8 : vector<16x1xf32> to vector<16x256xf32>
    %10 = arith.addf %6, %9 : vector<16x256xf32>
    %cst = arith.constant 0.000000e+00 : f32
    %11 = vector.broadcast %cst : f32 to vector<16x256xf32>
    %12 = arith.maximumf %10, %11 : vector<16x256xf32>
    %13 = arith.truncf %12 : vector<16x256xf32> to vector<16x256xbf16>
    %c0_7 = arith.constant 0 : index
    %c0_8 = arith.constant 0 : index
    %14 = vector.load %arg3[%c0_7, %c0_8] : memref<32x16xbf16, #tpu.memory_space<vmem>>, vector<32x16xbf16>
    %cst_9 = arith.constant dense<0.000000e+00> : vector<32x256xf32>
    %15 = tpu.matmul %14, %13, %cst_9 {dimension_numbers = #tpu.dot_dimension_numbers<[1], [0], [0], [1], [0, 0, 1, 1], [], []>} : vector<32x16xbf16>, vector<16x256xbf16>, vector<32x256xf32> -> vector<32x256xf32>
    %c0_10 = arith.constant 0 : index
    %c0_11 = arith.constant 0 : index
    %c0_12 = arith.constant 0 : index
    %16 = vector.load %arg4[%c0_10, %c0_11, %c0_12] : memref<1x32x256xf32, #tpu.memory_space<vmem>>, vector<1x32x256xf32>
    %17 = vector.shape_cast %16 : vector<1x32x256xf32> to vector<32x256xf32>
    %18 = vector.shape_cast %15 : vector<32x256xf32> to vector<1x32x256xf32>
    tpu.vector_store %arg4[%c0_10, %c0_11, %c0_12], %18 {strides = array<i32>} : memref<1x32x256xf32, #tpu.memory_space<vmem>>, vector<1x32x256xf32>,
    %cst_13 = arith.constant dense<0.000000e+00> : vector<32xf32>
    %19 = vector.multi_reduction <add>, %15, %cst_13 [1] : vector<32x256xf32> to vector<32xf32>
    %20 = vector.shape_cast %19 : vector<32xf32> to vector<32x1xf32>
    %21 = arith.mulf %15, %15 : vector<32x256xf32>
    %cst_14 = arith.constant dense<0.000000e+00> : vector<32xf32>
    %22 = vector.multi_reduction <add>, %21, %cst_14 [1] : vector<32x256xf32> to vector<32xf32>
    %23 = vector.shape_cast %22 : vector<32xf32> to vector<32x1xf32>
    %24 = tpu.concatenate %20, %23 in 1 : vector<32x1xf32>, vector<32x1xf32> -> vector<32x2xf32>
    %c0_15 = arith.constant 0 : index
    %c0_16 = arith.constant 0 : index
    %c0_17 = arith.constant 0 : index
    %25 = vector.load %arg5[%c0_15, %c0_16, %c0_17] : memref<1x32x2xf32, #tpu.memory_space<vmem>>, vector<1x32x2xf32>
    %26 = vector.shape_cast %25 : vector<1x32x2xf32> to vector<32x2xf32>
    %27 = vector.shape_cast %24 : vector<32x2xf32> to vector<1x32x2xf32>
    tpu.vector_store %arg5[%c0_15, %c0_16, %c0_17], %27 {strides = array<i32>} : memref<1x32x2xf32, #tpu.memory_space<vmem>>, vector<1x32x2xf32>,
    return
  }
  func.func @transform_0(%arg0: i32) -> (i32, i32, i32) {
    %c0_i32 = arith.constant 0 : i32
    %c0_i32_0 = arith.constant 0 : i32
    %c0_i32_1 = arith.constant 0 : i32
    return %arg0, %c0_i32, %c0_i32_0 : i32, i32, i32
  }
  func.func @transform_1(%arg0: i32) -> (i32, i32, i32) {
    %c0_i32 = arith.constant 0 : i32
    %c0_i32_0 = arith.constant 0 : i32
    %c0_i32_1 = arith.constant 0 : i32
    %c0_i32_2 = arith.constant 0 : i32
    return %c0_i32, %c0_i32_0, %c0_i32_1 : i32, i32, i32
  }
  func.func @transform_2(%arg0: i32) -> (i32, i32) {
    %c0_i32 = arith.constant 0 : i32
    %c0_i32_0 = arith.constant 0 : i32
    %c0_i32_1 = arith.constant 0 : i32
    return %c0_i32, %c0_i32_0 : i32, i32
  }
  func.func @transform_3(%arg0: i32) -> (i32, i32, i32) {
    %c0_i32 = arith.constant 0 : i32
    %c0_i32_0 = arith.constant 0 : i32
    %c0_i32_1 = arith.constant 0 : i32
    return %arg0, %c0_i32, %c0_i32_0 : i32, i32, i32
  }
  func.func @transform_4(%arg0: i32) -> (i32, i32, i32) {
    %c0_i32 = arith.constant 0 : i32
    %c0_i32_0 = arith.constant 0 : i32
    %c0_i32_1 = arith.constant 0 : i32
    return %arg0, %c0_i32, %c0_i32_0 : i32, i32, i32
  }
}

module attributes {stable_mosaic.version = 11 : i64} {
  func.func @kernel(%arg0: i32, %arg1: memref<1x32x256xf32, #tpu.memory_space<vmem>>, %arg2: memref<2x32x1xf32, #tpu.memory_space<vmem>>, %arg3: memref<1x32x256xf32, #tpu.memory_space<vmem>>, %arg4: memref<2x32x1xf32, #tpu.memory_space<vmem>>, %arg5: memref<1x32x256xf32, #tpu.memory_space<vmem>>) attributes {dimension_semantics = [#tpu.dimension_semantics<parallel>], iteration_bounds = array<i64: 2>, scalar_prefetch = 0 : i64, scratch_operands = 0 : i64, tpu.core_type = #tpu.core_type<tc>, window_params = [{transform_indices = @transform_0, window_bounds = array<i64: 1, 32, 256>}, {pipeline_mode = #tpu.pipeline_mode<synchronous>, transform_indices = @transform_1, window_bounds = array<i64: 2, 32, 1>}, {transform_indices = @transform_2, window_bounds = array<i64: 1, 32, 256>}, {pipeline_mode = #tpu.pipeline_mode<synchronous>, transform_indices = @transform_3, window_bounds = array<i64: 2, 32, 1>}, {transform_indices = @transform_4, window_bounds = array<i64: 1, 32, 256>}]} {
    %c0 = arith.constant 0 : index
    %c0_0 = arith.constant 0 : index
    %c0_1 = arith.constant 0 : index
    %0 = vector.load %arg1[%c0, %c0_0, %c0_1] : memref<1x32x256xf32, #tpu.memory_space<vmem>>, vector<1x32x256xf32>
    %1 = vector.shape_cast %0 : vector<1x32x256xf32> to vector<32x256xf32>
    %c0_2 = arith.constant 0 : index
    %c0_3 = arith.constant 0 : index
    %c0_4 = arith.constant 0 : index
    %2 = vector.load %arg2[%c0_2, %c0_3, %c0_4] : memref<2x32x1xf32, #tpu.memory_space<vmem>>, vector<1x32x1xf32>
    %3 = vector.shape_cast %2 : vector<1x32x1xf32> to vector<32x1xf32>
    %4 = vector.broadcast %3 : vector<32x1xf32> to vector<32x256xf32>
    %5 = arith.mulf %1, %4 : vector<32x256xf32>
    %c1 = arith.constant 1 : index
    %c0_5 = arith.constant 0 : index
    %c0_6 = arith.constant 0 : index
    %6 = vector.load %arg2[%c1, %c0_5, %c0_6] : memref<2x32x1xf32, #tpu.memory_space<vmem>>, vector<1x32x1xf32>
    %7 = vector.shape_cast %6 : vector<1x32x1xf32> to vector<32x1xf32>
    %8 = vector.broadcast %7 : vector<32x1xf32> to vector<32x256xf32>
    %9 = arith.addf %5, %8 : vector<32x256xf32>
    %c0_7 = arith.constant 0 : index
    %c0_8 = arith.constant 0 : index
    %c0_9 = arith.constant 0 : index
    %10 = vector.load %arg3[%c0_7, %c0_8, %c0_9] : memref<1x32x256xf32, #tpu.memory_space<vmem>>, vector<1x32x256xf32>
    %11 = vector.shape_cast %10 : vector<1x32x256xf32> to vector<32x256xf32>
    %c0_10 = arith.constant 0 : index
    %c0_11 = arith.constant 0 : index
    %c0_12 = arith.constant 0 : index
    %12 = vector.load %arg4[%c0_10, %c0_11, %c0_12] : memref<2x32x1xf32, #tpu.memory_space<vmem>>, vector<1x32x1xf32>
    %13 = vector.shape_cast %12 : vector<1x32x1xf32> to vector<32x1xf32>
    %14 = vector.broadcast %13 : vector<32x1xf32> to vector<32x256xf32>
    %15 = arith.mulf %11, %14 : vector<32x256xf32>
    %c1_13 = arith.constant 1 : index
    %c0_14 = arith.constant 0 : index
    %c0_15 = arith.constant 0 : index
    %16 = vector.load %arg4[%c1_13, %c0_14, %c0_15] : memref<2x32x1xf32, #tpu.memory_space<vmem>>, vector<1x32x1xf32>
    %17 = vector.shape_cast %16 : vector<1x32x1xf32> to vector<32x1xf32>
    %18 = vector.broadcast %17 : vector<32x1xf32> to vector<32x256xf32>
    %19 = arith.addf %15, %18 : vector<32x256xf32>
    %20 = arith.addf %9, %19 : vector<32x256xf32>
    %cst = arith.constant 0.000000e+00 : f32
    %21 = vector.broadcast %cst : f32 to vector<32x256xf32>
    %22 = arith.maximumf %20, %21 : vector<32x256xf32>
    %c0_16 = arith.constant 0 : index
    %c0_17 = arith.constant 0 : index
    %c0_18 = arith.constant 0 : index
    %23 = vector.load %arg5[%c0_16, %c0_17, %c0_18] : memref<1x32x256xf32, #tpu.memory_space<vmem>>, vector<1x32x256xf32>
    %24 = vector.shape_cast %23 : vector<1x32x256xf32> to vector<32x256xf32>
    %25 = vector.shape_cast %22 : vector<32x256xf32> to vector<1x32x256xf32>
    tpu.vector_store %arg5[%c0_16, %c0_17, %c0_18], %25 {strides = array<i32>} : memref<1x32x256xf32, #tpu.memory_space<vmem>>, vector<1x32x256xf32>,
    return
  }
  func.func @transform_0(%arg0: i32) -> (i32, i32, i32) {
    %c0_i32 = arith.constant 0 : i32
    %c0_i32_0 = arith.constant 0 : i32
    %c0_i32_1 = arith.constant 0 : i32
    return %arg0, %c0_i32, %c0_i32_0 : i32, i32, i32
  }
  func.func @transform_1(%arg0: i32) -> (i32, i32, i32) {
    %c0_i32 = arith.constant 0 : i32
    %c0_i32_0 = arith.constant 0 : i32
    %c0_i32_1 = arith.constant 0 : i32
    %c0_i32_2 = arith.constant 0 : i32
    return %c0_i32, %c0_i32_0, %c0_i32_1 : i32, i32, i32
  }
  func.func @transform_2(%arg0: i32) -> (i32, i32, i32) {
    %c0_i32 = arith.constant 0 : i32
    %c0_i32_0 = arith.constant 0 : i32
    %c0_i32_1 = arith.constant 0 : i32
    return %arg0, %c0_i32, %c0_i32_0 : i32, i32, i32
  }
  func.func @transform_3(%arg0: i32) -> (i32, i32, i32) {
    %c0_i32 = arith.constant 0 : i32
    %c0_i32_0 = arith.constant 0 : i32
    %c0_i32_1 = arith.constant 0 : i32
    %c0_i32_2 = arith.constant 0 : i32
    return %c0_i32, %c0_i32_0, %c0_i32_1 : i32, i32, i32
  }
  func.func @transform_4(%arg0: i32) -> (i32, i32, i32) {
    %c0_i32 = arith.constant 0 : i32
    %c0_i32_0 = arith.constant 0 : i32
    %c0_i32_1 = arith.constant 0 : i32
    return %arg0, %c0_i32, %c0_i32_0 : i32, i32, i32
  }
}

</mosaic_0001>

<bundles_post_ra>
// kernel: resnext_block_forward.4
= control target key start
LH: loop header
LB: loop body
LE: loop exit
PB: predicated region body
PF: predicated region fallthrough
CT: control target
= control target key end

     0   :  { %s605_s15 = smov 0   ;;  %s665_s0 = inlined_call_operand.vmem [shape: f32[2,16,256], index: 0, kind: input, shape index: {}]   ;;  %s666_s1 = inlined_call_operand.vmem [shape: bf16[48,16], index: 1, kind: input, shape index: {}]   ;;  %s667_s2 = inlined_call_operand.vmem [shape: bf16[2,16,256], index: 2, kind: output, shape index: {0}]   ;;  %s668_s3 = inlined_call_operand.vmem [shape: f32[2,32,256], index: 3, kind: output, shape index: {1}]   ;;  %s669_s4 = inlined_call_operand.vmem [shape: f32[2,48,2], index: 4, kind: output, shape index: {2}]  }
   0x1 LB: > { %s529_s16 = sadd.s32 4294967295, %s577_s15   ;;  %p533_p0 = scmp.ge.s32.totalorder %s577_s15, 1  ;;  %s577_s15 = sphi %s605_s15, %s15_s15  }
   0x2   : > { %p167_p1 = scmp.lt.s32.totalorder %s577_s15, 3 }
   0x4   : > { %p168_p2 = pnand %p533_p0, %p167_p1 }
   0x5   : > { %p203_p3 = scmp.lt.s32.totalorder (!%p168_p2), %s529_s16, 1  ;;  %v579_v0 = vmov (!%p168_p2), 0   ;;  %v568_v7 = vld [vmem:[%s666_s1] sm:$0xff] (!%p168_p2)   ;;  %v569_v8 = vld [vmem:[%s666_s1 + $0x8] sm:$0xff] (!%p168_p2)   ;;  %vm251_vm0 = vcmask (!%p168_p2), 130048   ;;  %v570_v9 = vld [vmem:[%s666_s1 + $0x10] sm:$0xff] (!%p168_p2)  }
   0x6   : > { %171 = sbr.rel (%p168_p2) target bundleno = 402 (0x192), region = 28  ;;  %293 = vmatprep.mubr.bf16.mxu0 (!%p168_p2), %v579_v0  ;;  %303 = vmatprep.mubr.bf16.mxu1 (!%p168_p2), %v579_v0  ;;  %vm394_vm1 = vcmask (!%p168_p2), 7168   ;;  %vm401_vm2 = vcmask (!%p168_p2), 15360  }
   0xd   : > { %s671_s16 = smov (!%p203_p3, %s529_s16), 1 }
   0xe   : > { %s551_s17 = sshll.u32 %s671_s16, 5  ;;  %s553_s27 = sshll.u32 %s671_s16, 6 }
   0xf   : > { %s207_s20 = scalar_lea.vmem %s665_s0, %s551_s17  ;;  %s632_s30 = scalar_lea.vmem %s668_s3, %s553_s27 }
  0x10   : > { %v225_v1 = vld [vmem:[%s207_s20 + $0x8] sm:$0xff]  ;;  %v227_v2 = vld [vmem:[%s207_s20 + $0x18] sm:$0xff]  ;;  %v224_v3 = vld [vmem:[%s207_s20] sm:$0xff]  ;;  %s552_s5 = sshll.u32 %s671_s16, 4  ;;  %s558_s9 = smul.u32 48, %s671_s16 }
  0x11   : > { %v229_v4 = vpack.c.bf16 %v227_v2, %v225_v1  ;;  %v226_v5 = vld [vmem:[%s207_s20 + $0x10] sm:$0xff]  ;;  %s212_s8 = scalar_lea.vmem %s667_s2, %s552_s5 }
  0x12   : > { %v228_v6 = vpack.c.bf16 %v226_v5, %v224_v3  ;;  %s222_s12 = scalar_lea.vmem %s669_s4, %s558_s9 }
  0x13   : > { %261 = vmatprep.subr.bf16.mxu0 %v229_v4  ;;  %556 = vmatprep.subr.bf16.mxu1 %v229_v4 }
  0x14   : > { %262 = vmatpush1.bf16.msra.mxu0 %v228_v6  ;;  %557 = vmatpush1.bf16.msra.mxu1 %v228_v6 }
  0x17   : > { %544 = vmatmul.mubr.msk.bf16.vlgmr.msra.gmra.mrb[0].mxu0 %vm251_vm0, %v568_v7  ;;  %545 = vmatmul.mubr.msk.bf16.vlgmr.msra.gmra.mrb[0].mxu1 %vm251_vm0, %v569_v8 }
  0x18   : > { %313 = vmatprep.mubr.bf16.mxu1 %v579_v0 }
  0x1f   : > { %546 = vmatmul.mubr.msk.bf16.gmra.mrb[4].mxu1 %vm251_vm0, %v570_v9 }
  0xea   : > { %v295_v10 = vpop.f32.mrb[0].mxu0  ;;  %v305_v11 = vpop.f32.mrb[0].mxu1 }
  0xeb   : > { %338 = vst [vmem:[%s632_s30] sm:$0xff] %v305_v11  ;;  %v297_v12 = vpop.f32.mrb[1].mxu0  ;;  %v307_v13 = vpop.f32.mrb[1].mxu1  ;;  %v364_v14 = vmul.f32 %v295_v10, %v295_v10  ;;  %v368_v15 = vmul.f32 %v305_v11, %v305_v11 }
  0xec   : > { %v554_v16 = vpack.c.bf16 %v297_v12, %v295_v10  ;;  %339 = vst [vmem:[%s632_s30 + $0x8] sm:$0xff] %v307_v13  ;;  %v299_v17 = vpop.f32.mrb[2].mxu0  ;;  %v309_v18 = vpop.f32.mrb[2].mxu1  ;;  %v352_v19 = vadd.f32 %v307_v13, %v305_v11  ;;  %v346_v20 = vadd.f32 %v297_v12, %v295_v10  ;;  %v365_v21 = vmul.f32 %v297_v12, %v297_v12 }
  0xed   : > { %340 = vst [vmem:[%s632_s30 + $0x10] sm:$0xff] %v309_v18  ;;  %v301_v22 = vpop.f32.mrb[3].mxu0  ;;  %v311_v23 = vpop.f32.mrb[3].mxu1  ;;  %v366_v24 = vmul.f32 %v299_v17, %v299_v17  ;;  %v370_v25 = vmul.f32 %v309_v18, %v309_v18  ;;  %v369_v26 = vmul.f32 %v307_v13, %v307_v13 }
  0xee   : > { %v555_v27 = vpack.c.bf16 %v301_v22, %v299_v17  ;;  %336 = vst [vmem:[%s212_s8] sm:$0xff] %v554_v16  ;;  %v367_v28 = vmul.f32 %v301_v22, %v301_v22  ;;  %341 = vst [vmem:[%s632_s30 + $0x18] sm:$0xff] %v311_v23  ;;  %353 = vadd.xlane.f32.xlu1 %v352_v19  ;;  %347 = vadd.xlane.f32.xlu0 %v346_v20 }
  0xef   : > { %v355_v29 = vadd.f32 %v311_v23, %v309_v18  ;;  %v349_v30 = vadd.f32 %v301_v22, %v299_v17  ;;  %v376_v31 = vadd.f32 %v365_v21, %v364_v14  ;;  %v371_v32 = vmul.f32 %v311_v23, %v311_v23 }
  0xf0   : > { %v382_v33 = vadd.f32 %v369_v26, %v368_v15  ;;  %337 = vst [vmem:[%s212_s8 + $0x8] sm:$0xff] %v555_v27  ;;  %v379_v34 = vadd.f32 %v367_v28, %v366_v24 }
  0xf1   : > { %v385_v35 = vadd.f32 %v371_v32, %v370_v25 }
  0xf2   : > { %356 = vadd.xlane.f32.xlu1 %v355_v29  ;;  %350 = vadd.xlane.f32.xlu0 %v349_v30  ;;  %v315_v36 = vpop.f32.mrb[4].mxu1 }
  0xf3   : > { %342 = vst [vmem:[%s632_s30 + $0x20] sm:$0xff] %v315_v36  ;;  %v317_v37 = vpop.f32.mrb[5].mxu1  ;;  %v372_v38 = vmul.f32 %v315_v36, %v315_v36 }
  0xf4   : > { %343 = vst [vmem:[%s632_s30 + $0x28] sm:$0xff] %v317_v37  ;;  %v319_v39 = vpop.f32.mrb[6].mxu1  ;;  %v358_v40 = vadd.f32 %v317_v37, %v315_v36  ;;  %v373_v41 = vmul.f32 %v317_v37, %v317_v37 }
  0xf5   : > { %344 = vst [vmem:[%s632_s30 + $0x30] sm:$0xff] %v319_v39  ;;  %v321_v42 = vpop.f32.mrb[7].mxu1  ;;  %v374_v43 = vmul.f32 %v319_v39, %v319_v39 }
  0xf6   : > { %380 = vadd.xlane.f32.xlu1 %v379_v34  ;;  %377 = vadd.xlane.f32.xlu0 %v376_v31  ;;  %345 = vst [vmem:[%s632_s30 + $0x38] sm:$0xff] %v321_v42  ;;  %v375_v44 = vmul.f32 %v321_v42, %v321_v42  ;;  %v361_v45 = vadd.f32 %v321_v42, %v319_v39 }
  0xf7   : > { %v388_v46 = vadd.f32 %v373_v41, %v372_v38 }
  0xf8   : > { %v391_v47 = vadd.f32 %v375_v44, %v374_v43 }
  0xfa   : > { %386 = vadd.xlane.f32.xlu1 %v385_v35  ;;  %383 = vadd.xlane.f32.xlu0 %v382_v33 }
  0xfe   : > { %362 = vadd.xlane.f32.xlu1 %v361_v45  ;;  %359 = vadd.xlane.f32.xlu0 %v358_v40 }
 0x102   : > { %392 = vadd.xlane.f32.xlu1 %v391_v47  ;;  %389 = vadd.xlane.f32.xlu0 %v388_v46 }
 0x17b   : > { %v354_v48 = vpop.xlane.xlu1 %353  ;;  %v348_v49 = vpop.xlane.xlu0 %347 }
 0x17f   : > { %v357_v50 = vpop.xlane.xlu1 %356  ;;  %v351_v51 = vpop.xlane.xlu0 %350 }
 0x183   : > { %v381_v52 = vpop.xlane.xlu1 %380  ;;  %v378_v53 = vpop.xlane.xlu0 %377 }
 0x184   : > { %v396_v54 = vsel %vm394_vm1, %v351_v51, %v381_v52  ;;  %v395_v55 = vsel %vm394_vm1, %v348_v49, %v378_v53 }
 0x185   : > { %403 = vst.msk [vmem:[%s222_s12 + $0x8] sm:$0xff] %vm401_vm2, %v396_v54  ;;  %402 = vst.msk [vmem:[%s222_s12] sm:$0xff] %vm401_vm2, %v395_v55 }
 0x187   : > { %v387_v56 = vpop.xlane.xlu1 %386  ;;  %v384_v57 = vpop.xlane.xlu0 %383 }
 0x188   : > { %v398_v58 = vsel %vm394_vm1, %v357_v50, %v387_v56  ;;  %v397_v59 = vsel %vm394_vm1, %v354_v48, %v384_v57 }
 0x189   : > { %405 = vst.msk [vmem:[%s222_s12 + $0x18] sm:$0xff] %vm401_vm2, %v398_v58  ;;  %404 = vst.msk [vmem:[%s222_s12 + $0x10] sm:$0xff] %vm401_vm2, %v397_v59 }
 0x18b   : > { %v363_v60 = vpop.xlane.xlu1 %362  ;;  %v360_v61 = vpop.xlane.xlu0 %359 }
 0x18f   : > { %v393_v62 = vpop.xlane.xlu1 %392  ;;  %v390_v63 = vpop.xlane.xlu0 %389 }
 0x190   : > { %v400_v0 = vsel %vm394_vm1, %v363_v60, %v393_v62  ;;  %v399_v1 = vsel %vm394_vm1, %v360_v61, %v390_v63 }
 0x191   : > { %407 = vst.msk [vmem:[%s222_s12 + $0x28] sm:$0xff] %vm401_vm2, %v400_v0  ;;  %406 = vst.msk [vmem:[%s222_s12 + $0x20] sm:$0xff] %vm401_vm2, %v399_v1 }
 0x192 PF: > { %s15_s15 = sadd.s32 1, %s577_s15  }
 0x193   : > { %p12_p4 = scmp.ge.s32.totalorder %s15_s15, 4  }
 0x195   :  { %14 = sbr.rel (!%p12_p4) target bundleno = 1 (0x1), region = 82 }

// kernel: resnext_block_forward.6
= control target key start
LH: loop header
LB: loop body
LE: loop exit
PB: predicated region body
PF: predicated region fallthrough
CT: control target
= control target key end

     0   :  { %s540_s15 = smov 0   ;;  %s583_s0 = inlined_call_operand.vmem [shape: bf16[2,16,256], index: 0, kind: input, shape index: {}]   ;;  %s584_s1 = inlined_call_operand.vmem [shape: f32[2,16,1], index: 1, kind: input, shape index: {}]   ;;  %s585_s2 = inlined_call_operand.vmem [shape: bf16[32,16], index: 2, kind: input, shape index: {}]   ;;  %s586_s3 = inlined_call_operand.vmem [shape: f32[2,32,256], index: 3, kind: output, shape index: {0}]   ;;  %s587_s4 = inlined_call_operand.vmem [shape: f32[2,32,2], index: 4, kind: output, shape index: {1}]  }
   0x1 LB: > { %s469_s16 = sadd.s32 4294967295, %s512_s15   ;;  %p473_p0 = scmp.ge.s32.totalorder %s512_s15, 1  ;;  %s512_s15 = sphi %s540_s15, %s15_s15  }
   0x2   : > { %p165_p1 = scmp.lt.s32.totalorder %s512_s15, 3 }
   0x4   : > { %p166_p2 = pnand %p473_p0, %p165_p1 }
   0x5   : > { %v480_v0 = vld [vmem:[%s584_s1 + $0x10] sm:$0xff] (!%p166_p2)  ;;  %v218_v1 = vld [vmem:[%s584_s1] sm:$0xff] (!%p166_p2)  ;;  %v514_v2 = vmov (!%p166_p2), 0   ;;  %v481_v3 = vld [vmem:[%s584_s1 + $0x18] sm:$0xff] (!%p166_p2)  ;;  %p196_p3 = scmp.lt.s32.totalorder (!%p166_p2), %s469_s16, 1  ;;  %vm271_vm0 = vcmask (!%p166_p2), 130048  }
   0x6   : > { %169 = sbr.rel (%p166_p2) target bundleno = 526 (0x20e), region = 32  ;;  %503 = vset.pattern.permute.xlu1 (!%p166_p2), %v514_v2  ;;  %502 = vset.pattern.permute.xlu0 (!%p166_p2), %v514_v2  ;;  %v219_v4 = vld [vmem:[%s584_s1 + $0x8] sm:$0xff] (!%p166_p2)  ;;  %v504_v29 = vld [vmem:[%s585_s2] sm:$0xff] (!%p166_p2)   ;;  %vm371_vm1 = vcmask (!%p166_p2), 7168   ;;  %vm376_vm2 = vcmask (!%p166_p2), 15360  }
   0x7   : > { %239 = vperm.xlu1 (!%p166_p2), %503, %v480_v0   ;;  %222 = vperm.xlu0 (!%p166_p2), %502, %v218_v1   ;;  %v505_v30 = vld [vmem:[%s585_s2 + $0x8] sm:$0xff] (!%p166_p2)  }
   0x8   : > { %310 = vmatprep.mubr.bf16.mxu0 (!%p166_p2), %v514_v2  ;;  %320 = vmatprep.mubr.bf16.mxu1 (!%p166_p2), %v514_v2 }
   0xb   : > { %244 = vperm.xlu1 (!%p166_p2), %503, %v481_v3   ;;  %227 = vperm.xlu0 (!%p166_p2), %502, %v219_v4  }
   0xd   : > { %s589_s16 = smov (!%p196_p3, %s469_s16), 1 }
   0xe   : > { %s488_s25 = sshll.u32 %s589_s16, 4  ;;  %s489_s7 = sshll.u32 %s589_s16, 6 }
   0xf   : > { %s200_s28 = scalar_lea.vmem %s583_s0, %s488_s25  ;;  %s205_s10 = scalar_lea.vmem %s586_s3, %s489_s7 }
  0x10   : > { %v212_v5 = vld [vmem:[%s200_s28] sm:$0xff]  ;;  %v213_v8 = vld [vmem:[%s200_s28 + $0x8] sm:$0xff]  ;;  %s490_s11 = sshll.u32 %s589_s16, 5 }
  0x11   : > { %v214_v6 = vunpack.c.l.bf16 %v212_v5  ;;  %v215_v7 = vunpack.c.h.bf16 %v212_v5  ;;  %v216_v13 = vunpack.c.l.bf16 %v213_v8  ;;  %v217_v14 = vunpack.c.h.bf16 %v213_v8  ;;  %s210_s14 = scalar_lea.vmem %s587_s4, %s490_s11 }
  0x86   : > { %v240_v9 = vpop.permute.xlu1 %239  ;;  %v223_v10 = vpop.permute.xlu0 %222 }
  0x87   : > { %v230_v11 = vmul.f32 %v223_v10, %v214_v6  ;;  %v231_v12 = vmul.f32 %v223_v10, %v215_v7 }
  0x89   : > { %v247_v16 = vadd.f32 %v240_v9, %v230_v11  ;;  %v248_v17 = vadd.f32 %v240_v9, %v231_v12 }
  0x8a   : > { %v228_v15 = vpop.permute.xlu0 %227  ;;  %v245_v20 = vpop.permute.xlu1 %244 }
  0x8b   : > { %v232_v18 = vmul.f32 %v228_v15, %v216_v13  ;;  %v233_v19 = vmul.f32 %v228_v15, %v217_v14  ;;  %v252_v23 = vmax.f32 %v248_v17, 0.0  ;;  %v251_v25 = vmax.f32 %v247_v16, 0.0 }
  0x8d   : > { %v249_v21 = vadd.f32 %v245_v20, %v232_v18  ;;  %v250_v22 = vadd.f32 %v245_v20, %v233_v19 }
  0x8f   : > { %v254_v24 = vmax.f32 %v250_v22, 0.0  ;;  %v253_v26 = vmax.f32 %v249_v21, 0.0 }
  0x91   : > { %v256_v27 = vpack.c.bf16 %v254_v24, %v252_v23  ;;  %v255_v28 = vpack.c.bf16 %v253_v26, %v251_v25 }
  0x93   : > { %278 = vmatprep.subr.bf16.mxu0 %v256_v27  ;;  %491 = vmatprep.subr.bf16.mxu1 %v256_v27 }
  0x94   : > { %279 = vmatpush1.bf16.msra.mxu0 %v255_v28  ;;  %492 = vmatpush1.bf16.msra.mxu1 %v255_v28 }
  0x97   : > { %484 = vmatmul.mubr.msk.bf16.vlgmr.msra.gmra.mrb[0].mxu0 %vm271_vm0, %v504_v29  ;;  %485 = vmatmul.mubr.msk.bf16.vlgmr.msra.gmra.mrb[0].mxu1 %vm271_vm0, %v505_v30 }
 0x16a   : > { %v312_v31 = vpop.f32.mrb[0].mxu0  ;;  %v322_v32 = vpop.f32.mrb[0].mxu1 }
 0x16b   : > { %331 = vst [vmem:[%s205_s10] sm:$0xff] %v312_v31  ;;  %v314_v33 = vpop.f32.mrb[1].mxu0  ;;  %335 = vst [vmem:[%s205_s10 + $0x20] sm:$0xff] %v322_v32  ;;  %v324_v34 = vpop.f32.mrb[1].mxu1  ;;  %v351_v35 = vmul.f32 %v312_v31, %v312_v31  ;;  %v355_v36 = vmul.f32 %v322_v32, %v322_v32 }
 0x16c   : > { %332 = vst [vmem:[%s205_s10 + $0x8] sm:$0xff] %v314_v33  ;;  %v316_v37 = vpop.f32.mrb[2].mxu0  ;;  %336 = vst [vmem:[%s205_s10 + $0x28] sm:$0xff] %v324_v34  ;;  %v326_v38 = vpop.f32.mrb[2].mxu1  ;;  %v339_v39 = vadd.f32 %v314_v33, %v312_v31  ;;  %v345_v40 = vadd.f32 %v324_v34, %v322_v32  ;;  %v352_v41 = vmul.f32 %v314_v33, %v314_v33 }
 0x16d   : > { %v356_v42 = vmul.f32 %v324_v34, %v324_v34  ;;  %333 = vst [vmem:[%s205_s10 + $0x10] sm:$0xff] %v316_v37  ;;  %v318_v43 = vpop.f32.mrb[3].mxu0  ;;  %337 = vst [vmem:[%s205_s10 + $0x30] sm:$0xff] %v326_v38  ;;  %v328_v44 = vpop.f32.mrb[3].mxu1  ;;  %v353_v45 = vmul.f32 %v316_v37, %v316_v37  ;;  %v357_v46 = vmul.f32 %v326_v38, %v326_v38 }
 0x16e   : > { %334 = vst [vmem:[%s205_s10 + $0x18] sm:$0xff] %v318_v43  ;;  %v354_v47 = vmul.f32 %v318_v43, %v318_v43  ;;  %338 = vst [vmem:[%s205_s10 + $0x38] sm:$0xff] %v328_v44  ;;  %v358_v48 = vmul.f32 %v328_v44, %v328_v44  ;;  %340 = vadd.xlane.f32.xlu0 %v339_v39  ;;  %v342_v49 = vadd.f32 %v318_v43, %v316_v37 }
 0x16f   : > { %v359_v50 = vadd.f32 %v352_v41, %v351_v35  ;;  %v348_v51 = vadd.f32 %v328_v44, %v326_v38  ;;  %v365_v52 = vadd.f32 %v356_v42, %v355_v36 }
 0x170   : > { %343 = vadd.xlane.f32.xlu1 %v342_v49  ;;  %v362_v53 = vadd.f32 %v354_v47, %v353_v45  ;;  %v368_v54 = vadd.f32 %v358_v48, %v357_v46 }
 0x172   : > { %346 = vadd.xlane.f32.xlu0 %v345_v40 }
 0x174   : > { %360 = vadd.xlane.f32.xlu1 %v359_v50 }
 0x176   : > { %349 = vadd.xlane.f32.xlu0 %v348_v51 }
 0x178   : > { %366 = vadd.xlane.f32.xlu1 %v365_v52 }
 0x17a   : > { %363 = vadd.xlane.f32.xlu0 %v362_v53 }
 0x17e   : > { %369 = vadd.xlane.f32.xlu0 %v368_v54 }
 0x1fb   : > { %v341_v55 = vpop.xlane.xlu0 %340 }
 0x1fd   : > { %v344_v56 = vpop.xlane.xlu1 %343 }
 0x1ff   : > { %v347_v57 = vpop.xlane.xlu0 %346 }
 0x201   : > { %v361_v58 = vpop.xlane.xlu1 %360 }
 0x202   : > { %v372_v59 = vsel %vm371_vm1, %v341_v55, %v361_v58 }
 0x203   : > { %377 = vst.msk [vmem:[%s210_s14] sm:$0xff] %vm376_vm2, %v372_v59  ;;  %v350_v60 = vpop.xlane.xlu0 %349 }
 0x205   : > { %v367_v61 = vpop.xlane.xlu1 %366 }
 0x206   : > { %v374_v62 = vsel %vm371_vm1, %v347_v57, %v367_v61 }
 0x207   : > { %379 = vst.msk [vmem:[%s210_s14 + $0x10] sm:$0xff] %vm376_vm2, %v374_v62  ;;  %v364_v63 = vpop.xlane.xlu0 %363 }
 0x208   : > { %v373_v0 = vsel %vm371_vm1, %v344_v56, %v364_v63 }
 0x209   : > { %378 = vst.msk [vmem:[%s210_s14 + $0x8] sm:$0xff] %vm376_vm2, %v373_v0 }
 0x20b   : > { %v370_v1 = vpop.xlane.xlu0 %369 }
 0x20c   : > { %v375_v2 = vsel %vm371_vm1, %v350_v60, %v370_v1 }
 0x20d   : > { %380 = vst.msk [vmem:[%s210_s14 + $0x18] sm:$0xff] %vm376_vm2, %v375_v2 }
 0x20e PF: > { %s15_s15 = sadd.s32 1, %s512_s15  }
 0x20f   : > { %p12_p4 = scmp.ge.s32.totalorder %s15_s15, 4  }
 0x211   :  { %14 = sbr.rel (!%p12_p4) target bundleno = 1 (0x1), region = 75 }

// kernel: resnext_block_forward.5
= control target key start
LH: loop header
LB: loop body
LE: loop exit
PB: predicated region body
PF: predicated region fallthrough
CT: control target
= control target key end

     0   :  { %s1518_s18 = smov 0   ;;  %s1717_s0 = inlined_call_operand.vmem [shape: bf16[2,16,256], index: 0, kind: input, shape index: {}]   ;;  %s1718_s1 = inlined_call_operand.vmem [shape: f32[2,16,1], index: 1, kind: input, shape index: {}]   ;;  %s1719_s2 = inlined_call_operand.vmem [shape: bf16[9,16,16], index: 2, kind: input, shape index: {}]   ;;  %s1720_s3 = inlined_call_operand.vmem [shape: bf16[9,1,256], index: 3, kind: input, shape index: {}]   ;;  %s1721_s4 = inlined_call_operand.vmem [shape: bf16[2,16,256], index: 4, kind: output, shape index: {0}]   ;;  %s1722_s5 = inlined_call_operand.vmem [shape: f32[2,16,2], index: 5, kind: output, shape index: {1}]  }
   0x1 LB: > { %s1338_s19 = sadd.s32 4294967295, %s1476_s18   ;;  %p1342_p0 = scmp.ge.s32.totalorder %s1476_s18, 1  ;;  %s1476_s18 = sphi %s1518_s18, %s16_s18  }
   0x2   : > { %p190_p1 = scmp.lt.s32.totalorder %s1476_s18, 3 }
   0x4   : > { %p191_p2 = pnand %p1342_p0, %p190_p1 }
   0x5   : > { %v1349_v0 = vld [vmem:[%s1718_s1 + $0x10] sm:$0xff] (!%p191_p2)  ;;  %v245_v1 = vld [vmem:[%s1718_s1] sm:$0xff] (!%p191_p2)  ;;  %v1478_v2 = vmov (!%p191_p2), 0   ;;  %v1350_v3 = vld [vmem:[%s1718_s1 + $0x18] sm:$0xff] (!%p191_p2)  ;;  %p223_p3 = scmp.lt.s32.totalorder (!%p191_p2), %s1338_s19, 1  ;;  %s1479_s7 = smov (!%p191_p2), 1   ;;  %v314_v31 = vlaneseq (!%p191_p2) }
   0x6   : > { %194 = sbr.rel (%p191_p2) target bundleno = 686 (0x2ae), region = 36  ;;  %1460 = vset.pattern.permute.xlu1 (!%p191_p2), %v1478_v2  ;;  %1459 = vset.pattern.permute.xlu0 (!%p191_p2), %v1478_v2  ;;  %v246_v4 = vld [vmem:[%s1718_s1 + $0x8] sm:$0xff] (!%p191_p2)  ;;  %s1480_s8 = smov (!%p191_p2), 17   ;;  %v1487_v29 = vmov (!%p191_p2), 1966171168   ;;  %vm669_vm0 = vcmask (!%p191_p2), 7168  }
   0x7   : > { %266 = vperm.xlu1 (!%p191_p2), %1460, %v1349_v0   ;;  %249 = vperm.xlu0 (!%p191_p2), %1459, %v245_v1   ;;  %s1481_s9 = smov (!%p191_p2), 127   ;;  %s1482_s10 = smov (!%p191_p2), 113   ;;  %v312_v30 = vunpack.c.l.s4 (!%p191_p2), %v1487_v29  ;;  %v315_v33 = vshrl.u32 (!%p191_p2), %v314_v31, 7  ;;  %vm293_vm1 = vcmask (!%p191_p2), 138240   ;;  %vm348_vm2 = vcmask (!%p191_p2), 130048  }
   0x8   : > { %760 = vmatprep.mubr.bf16.mxu0 (!%p191_p2), %v1478_v2  ;;  %384 = vmatprep.mubr.bf16.mxu1 (!%p191_p2), %v1478_v2  ;;  %s1483_s11 = smov (!%p191_p2), 16   ;;  %s1484_s12 = smov (!%p191_p2), 112   ;;  %v1371_v34 = vld.sshfl [vmem:[%s1720_s3 + $0x6] sm:$0x11 pattern:$0x75316420] (!%p191_p2) }
   0x9   : > { %s1485_s13 = smov (!%p191_p2), 15   ;;  %s1486_s14 = smov (!%p191_p2), 111   ;;  %v313_v32 = vunpack.c.0.s8 (!%p191_p2), %v312_v30  ;;  %v1353_v35 = vld.sshfl [vmem:[%s1720_s3] sm:$0x11 pattern:$0x75316420] (!%p191_p2)  ;;  %v686_v37 = vcombine.high (!%p191_p2), %v1371_v34, %v1371_v34 }
   0xa   : > { %v310_v38 = vcombine.high (!%p191_p2), %v1353_v35, %v1353_v35  ;;  %v1377_v41 = vld.sshfl [vmem:[%s1720_s3 + $0xa] sm:$0x11 pattern:$0x75316420] (!%p191_p2)  ;;  %v1582_v43 = vsub.s32 (!%p191_p2), 0, %v315_v33  ;;  %vm779_vm3 = vcmask (!%p191_p2), 1039360  }
   0xb   : > { %271 = vperm.xlu1 (!%p191_p2), %1460, %v1350_v3   ;;  %254 = vperm.xlu0 (!%p191_p2), %1459, %v246_v4   ;;  %v1574_v36 = vsub.s32 (!%p191_p2), %v313_v32, %v315_v33  ;;  %v796_v46 = vcombine.high (!%p191_p2), %v1377_v41, %v1377_v41  ;;  %v1383_v48 = vld.sshfl [vmem:[%s1720_s3 + $0xc] sm:$0x11 pattern:$0x75316420] (!%p191_p2)  ;;  %vm889_vm4 = vcmask (!%p191_p2), 924672   ;;  %vm999_vm5 = vcmask (!%p191_p2), 916480  }
   0xc   : > { %v906_v51 = vcombine.high (!%p191_p2), %v1383_v48, %v1383_v48  ;;  %v1359_v56 = vld.sshfl [vmem:[%s1720_s3 + $0x2] sm:$0x11 pattern:$0x75316420] (!%p191_p2)  ;;  %vm559_vm6 = vcmask (!%p191_p2), 121856   ;;  %vm1109_vm7 = vcmask (!%p191_p2), 908288  }
   0xd   : > { %s1724_s19 = smov (!%p223_p3, %s1338_s19), 1  ;;  %v700_v39 = vrot.slane %v686_v37, %v1574_v36  ;;  %v693_v40 = vrot.slane %v1371_v34, %v1574_v36  ;;  %v324_v42 = vrot.slane %v310_v38, %v1574_v36  ;;  %v317_v47 = vrot.slane %v1353_v35, %v1574_v36  ;;  %v1637_v37 = vld.sshfl [vmem:[%s1720_s3 + $0x10] sm:$0x11 pattern:$0x75316420] }
   0xe   : > { %s1542_s28 = sshll.u32 %s1724_s19, 4  ;;  %v803_v50 = vrot.slane %v1377_v41, %v1574_v36  ;;  %v810_v54 = vrot.slane %v796_v46, %v1574_v36  ;;  %v920_v63 = vrot.slane %v906_v51, %v1574_v36  ;;  %v466_v0 = vcombine.high %v1359_v56, %v1359_v56 }
   0xf   : > { %s227_s6 = scalar_lea.vmem %s1717_s0, %s1542_s28  ;;  %v709_v44 = vpack.i.b16 %v700_v39, %v700_v39  ;;  %v702_v45 = vpack.i.b16 %v693_v40, %v693_v40  ;;  %v333_v49 = vpack.i.b16 %v324_v42, %v324_v42  ;;  %v326_v55 = vpack.i.b16 %v317_v47, %v317_v47  ;;  %s232_s30 = scalar_lea.vmem %s1721_s4, %s1542_s28 }
  0x10   : > { %v239_v5 = vld [vmem:[%s227_s6] sm:$0xff]  ;;  %v240_v8 = vld [vmem:[%s227_s6 + $0x8] sm:$0xff]  ;;  %v812_v60 = vpack.i.b16 %v803_v50, %v803_v50  ;;  %v819_v4 = vpack.i.b16 %v810_v54, %v810_v54  ;;  %v473_v35 = vrot.slane %v1359_v56, %v1574_v36  ;;  %vm1247_vm8 = vcmask 15360  }
  0x11   : > { %v241_v6 = vunpack.c.l.bf16 %v239_v5  ;;  %v242_v7 = vunpack.c.h.bf16 %v239_v5  ;;  %v243_v13 = vunpack.c.l.bf16 %v240_v8  ;;  %v244_v14 = vunpack.c.h.bf16 %v240_v8  ;;  %v1463_v50 = vld [vmem:[%s1719_s2 + $0x28] sm:$0xff]  }
  0x12   : > { %v714_v52 = vrot.slane %v709_v44, %v1582_v43  ;;  %v707_v53 = vrot.slane %v702_v45, %v1582_v43  ;;  %v338_v59 = vrot.slane %v333_v49, %v1582_v43  ;;  %v331_v5 = vrot.slane %v326_v55, %v1582_v43 }
  0x13   : > { %v1126_v45 = vcombine.high %v1637_v37, %v1637_v37  ;;  %v482_v47 = vpack.i.b16 %v473_v35, %v473_v35 }
  0x15   : > { %v1140_v55 = vrot.slane %v1126_v45, %v1574_v36 }
  0x86   : > { %v267_v9 = vpop.permute.xlu1 %266  ;;  %v250_v10 = vpop.permute.xlu0 %249 }
  0x87   : > { %v257_v11 = vmul.f32 %v250_v10, %v241_v6  ;;  %v258_v12 = vmul.f32 %v250_v10, %v242_v7  ;;  %v1603_v6 = vld.sshfl [vmem:[%s1720_s3 + $0xe] sm:$0x11 pattern:$0x75316420]  ;;  %v817_v10 = vrot.slane %v812_v60, %v1582_v43 }
  0x89   : > { %v274_v16 = vadd.f32 %v267_v9, %v257_v11  ;;  %v275_v17 = vadd.f32 %v267_v9, %v258_v12  ;;  %v1461_v9 = vld [vmem:[%s1719_s2 + $0x18] sm:$0xff]  }
  0x8a   : > { %v255_v15 = vpop.permute.xlu0 %254  ;;  %v272_v20 = vpop.permute.xlu1 %271 }
  0x8b   : > { %v259_v18 = vmul.f32 %v255_v15, %v243_v13  ;;  %v260_v19 = vmul.f32 %v255_v15, %v244_v14  ;;  %v278_v23 = vmax.f32 %v274_v16, 0.0  ;;  %v279_v24 = vmax.f32 %v275_v17, 0.0 }
  0x8c   : > { %v929_v13 = vpack.i.b16 %v920_v63, %v920_v63  ;;  %v480_v14 = vrot.slane %v466_v0, %v1574_v36  ;;  %v824_v16 = vrot.slane %v819_v4, %v1582_v43 }
  0x8d   : > { %v276_v21 = vadd.f32 %v272_v20, %v259_v18  ;;  %v277_v22 = vadd.f32 %v272_v20, %v260_v19  ;;  %v1016_v18 = vcombine.high %v1603_v6, %v1603_v6  ;;  %v913_v19 = vrot.slane %v1383_v48, %v1574_v36  ;;  %v1619_v20 = vld.sshfl [vmem:[%s1720_s3 + $0x4] sm:$0x11 pattern:$0x75316420] }
  0x8e   : > { %v489_v29 = vpack.i.b16 %v480_v14, %v480_v14  ;;  %v576_v33 = vcombine.high %v1619_v20, %v1619_v20 }
  0x8f   : > { %v280_v25 = vmax.f32 %v276_v21, 0.0  ;;  %v281_v26 = vmax.f32 %v277_v22, 0.0  ;;  %v1030_v32 = vrot.slane %v1016_v18, %v1574_v36  ;;  %v922_v34 = vpack.i.b16 %v913_v19, %v913_v19 }
  0x90   : > { %v494_v40 = vrot.slane %v489_v29, %v1582_v43  ;;  %v590_v44 = vrot.slane %v576_v33, %v1574_v36 }
  0x91   : > { %v1548_v27 = vpack.c.bf16 %v280_v25, %v278_v23  ;;  %v1550_v28 = vpack.c.bf16 %v281_v26, %v279_v24  ;;  %v1462_v23 = vld [vmem:[%s1719_s2] sm:$0xff]   ;;  %v934_v26 = vrot.slane %v929_v13, %v1582_v43  ;;  %v1039_v42 = vpack.i.b16 %v1030_v32, %v1030_v32  ;;  %v1468_v32 = vld [vmem:[%s1719_s2 + $0x10] sm:$0xff]  }
  0x92   : > { %v927_v46 = vrot.slane %v922_v34, %v1582_v43  ;;  %v599_v54 = vpack.i.b16 %v590_v44, %v590_v44 }
  0x93   : > { %667 = vrot.lane.b32.xlu1 %v1550_v28, %s1479_s7  ;;  %665 = vrot.lane.b32.xlu0 %v1548_v27, %s1479_s7 }
  0x97   : > { %291 = vrot.lane.b32.xlu1 %v1550_v28, %s1480_s8  ;;  %289 = vrot.lane.b32.xlu0 %v1548_v27, %s1480_s8  ;;  %s237_s8 = scalar_lea.vmem %s1722_s5, %s1542_s28 }
  0x9b   : > { %775 = vrot.lane.b32.xlu1 %v1548_v27, %s1481_s9  ;;  %777 = vrot.lane.b32.xlu0 %v1550_v28, %s1481_s9 }
  0x9f   : > { %885 = vrot.lane.b32.xlu1 %v1548_v27, %s1482_s10  ;;  %887 = vrot.lane.b32.xlu0 %v1550_v28, %s1482_s10 }
  0xa3   : > { %448 = vrot.lane.b32.xlu1 %v1550_v28, %s1483_s11  ;;  %446 = vrot.lane.b32.xlu0 %v1548_v27, %s1483_s11 }
  0xa7   : > { %995 = vrot.lane.b32.xlu1 %v1548_v27, %s1484_s12  ;;  %997 = vrot.lane.b32.xlu0 %v1550_v28, %s1484_s12 }
  0xab   : > { %557 = vrot.lane.b32.xlu1 %v1550_v28, %s1485_s13  ;;  %555 = vrot.lane.b32.xlu0 %v1548_v27, %s1485_s13 }
  0xaf   : > { %1105 = vrot.lane.b32.xlu1 %v1548_v27, %s1486_s14  ;;  %1107 = vrot.lane.b32.xlu0 %v1550_v28, %s1486_s14 }
 0x105   : > { %v668_v57 = vpop.permute.xlu1 %667  ;;  %v666_v58 = vpop.permute.xlu0 %665 }
 0x106   : > { %v674_v61 = vsel %vm669_vm0, 0, %v666_v58  ;;  %v670_v62 = vsel %vm669_vm0, %v666_v58, %v668_v57  ;;  %v487_v57 = vrot.slane %v482_v47, %v1582_v43  ;;  %v1023_v58 = vrot.slane %v1603_v6, %v1574_v36 }
 0x107   : > { %v716_v1 = vmul.bf16 %v714_v52, %v670_v62  ;;  %v715_v3 = vmul.bf16 %v707_v53, %v674_v61  ;;  %v1044_v53 = vrot.slane %v1039_v42, %v1582_v43  ;;  %v1464_v62 = vld [vmem:[%s1719_s2 + $0x20] sm:$0xff]   ;;  %v583_v6 = vrot.slane %v1619_v20, %v1574_v36 }
 0x109   : > { %v292_v7 = vpop.permute.xlu1 %291  ;;  %728 = vmatprep.subr.bf16.mxu0 %v716_v1  ;;  %v290_v8 = vpop.permute.xlu0 %289  ;;  %v604_v1 = vrot.slane %v599_v54, %v1582_v43  ;;  %v592_v13 = vpack.i.b16 %v583_v6, %v583_v6 }
 0x10a   : > { %v299_v11 = vsel %vm293_vm1, 0, %v290_v8  ;;  %729 = vmatpush1.bf16.msra.mxu0 %v715_v3  ;;  %v294_v12 = vsel %vm293_vm1, %v290_v8, %v292_v7  ;;  %v1149_v3 = vpack.i.b16 %v1140_v55, %v1140_v55 }
 0x10b   : > { %v340_v15 = vmul.bf16 %v338_v59, %v294_v12  ;;  %v339_v17 = vmul.bf16 %v331_v5, %v299_v11  ;;  %v1032_v5 = vpack.i.b16 %v1023_v58, %v1023_v58  ;;  %v597_v20 = vrot.slane %v592_v13, %v1582_v43 }
 0x10c   : > { %v1154_v11 = vrot.slane %v1149_v3, %v1582_v43 }
 0x10d   : > { %v776_v21 = vpop.permute.xlu1 %775  ;;  %352 = vmatprep.subr.bf16.mxu1 %v340_v15  ;;  %1375 = vmatmul.mubr.msk.bf16.vlgmr.msra.gmra.mrb[0].mxu0 %vm348_vm2, %v1461_v9  ;;  %v778_v22 = vpop.permute.xlu0 %777  ;;  %v1037_v12 = vrot.slane %v1032_v5, %v1582_v43 }
 0x10e   : > { %v780_v24 = vsel %vm779_vm3, %v776_v21, %v778_v22  ;;  %v784_v25 = vsel %vm779_vm3, %v778_v22, 0  ;;  %353 = vmatpush1.bf16.msra.mxu1 %v339_v17  ;;  %870 = vmatprep.mubr.bf16.mxu0 %v1478_v2  ;;  %v1133_v21 = vrot.slane %v1637_v37, %v1574_v36 }
 0x10f   : > { %v825_v30 = vmul.bf16 %v817_v10, %v780_v24  ;;  %v826_v31 = vmul.bf16 %v824_v16, %v784_v25  ;;  %403 = vmatprep.subr.bf16.mxu1 %v1550_v28  ;;  %v1465_v16 = vld [vmem:[%s1719_s2 + $0x30] sm:$0xff]  }
 0x110   : > { %v1142_v25 = vpack.i.b16 %v1133_v21, %v1133_v21 }
 0x111   : > { %v886_v38 = vpop.permute.xlu1 %885  ;;  %1355 = vmatmul.mubr.msk.bf16.vlgmr.msra.gmra.mrb[0].mxu1 %vm348_vm2, %v1462_v23  ;;  %838 = vmatprep.subr.bf16.mxu0 %v826_v31  ;;  %v888_v39 = vpop.permute.xlu0 %887  ;;  %v1466_v23 = vld [vmem:[%s1719_s2 + $0x8] sm:$0xff]  }
 0x112   : > { %v894_v28 = vsel %vm889_vm4, %v888_v39, 0  ;;  %404 = vmatpush1.bf16.msra.mxu1 %v1548_v27  ;;  %839 = vmatpush1.bf16.msra.mxu0 %v825_v30  ;;  %v890_v48 = vsel %vm889_vm4, %v886_v38, %v888_v39  ;;  %v1147_v36 = vrot.slane %v1142_v25, %v1582_v43  ;;  %v1467_v30 = vld [vmem:[%s1719_s2 + $0x38] sm:$0xff]   ;;  %v1469_v43 = vld [vmem:[%s1719_s2 + $0x40] sm:$0xff]  }
 0x113   : > { %v936_v41 = vmul.bf16 %v934_v26, %v894_v28  ;;  %435 = vmatprep.mubr.bf16.mxu1 %v1478_v2  ;;  %v935_v56 = vmul.bf16 %v927_v46, %v890_v48 }
 0x115   : > { %v449_v49 = vpop.permute.xlu1 %448  ;;  %948 = vmatprep.subr.bf16.mxu0 %v936_v41  ;;  %v447_v27 = vpop.permute.xlu0 %446 }
 0x116   : > { %v451_v51 = vsel %vm348_vm2, %v447_v27, %v449_v49  ;;  %v454_v59 = vsel %vm348_vm2, 0, %v447_v27 }
 0x117   : > { %v496_v52 = vmul.bf16 %v494_v40, %v451_v51  ;;  %v495_v4 = vmul.bf16 %v487_v57, %v454_v59 }
 0x119   : > { %v996_v60 = vpop.permute.xlu1 %995  ;;  %508 = vmatprep.subr.bf16.mxu1 %v496_v52  ;;  %1381 = vmatmul.mubr.msk.bf16.vlgmr.msra.gmra.mrb[0].mxu0 %vm348_vm2, %v1463_v50  ;;  %v998_v61 = vpop.permute.xlu0 %997 }
 0x11a   : > { %949 = vmatpush1.bf16.msra.mxu0 %v935_v56  ;;  %v1004_v63 = vsel %vm999_vm5, %v998_v61, 0  ;;  %980 = vmatprep.mubr.bf16.mxu0 %v1478_v2  ;;  %v1000_v14 = vsel %vm999_vm5, %v996_v60, %v998_v61 }
 0x11b   : > { %v1046_v0 = vmul.bf16 %v1044_v53, %v1004_v63  ;;  %v1045_v19 = vmul.bf16 %v1037_v12, %v1000_v14 }
 0x11d   : > { %v558_v7 = vpop.permute.xlu1 %557  ;;  %1357 = vmatmul.mubr.msk.bf16.vlgmr.msra.gmra.mrb[0].mxu1 %vm348_vm2, %v1464_v62  ;;  %1058 = vmatprep.subr.bf16.mxu0 %v1046_v0  ;;  %v556_v8 = vpop.permute.xlu0 %555 }
 0x11e   : > { %509 = vmatpush1.bf16.msra.mxu1 %v495_v4  ;;  %v560_v9 = vsel %vm559_vm6, %v556_v8, %v558_v7  ;;  %540 = vmatprep.mubr.bf16.mxu1 %v1478_v2  ;;  %v564_v22 = vsel %vm559_vm6, 0, %v556_v8 }
 0x11f   : > { %v606_v10 = vmul.bf16 %v604_v1, %v560_v9  ;;  %v605_v24 = vmul.bf16 %v597_v20, %v564_v22 }
 0x121   : > { %618 = vmatprep.subr.bf16.mxu1 %v606_v10  ;;  %v1108_v15 = vpop.permute.xlu0 %1107  ;;  %v1106_v26 = vpop.permute.xlu1 %1105 }
 0x122   : > { %v1114_v17 = vsel %vm1109_vm7, %v1108_v15, 0  ;;  %v1110_v29 = vsel %vm1109_vm7, %v1106_v26, %v1108_v15 }
 0x123   : > { %v1156_v18 = vmul.bf16 %v1154_v11, %v1114_v17  ;;  %v1155_v31 = vmul.bf16 %v1147_v36, %v1110_v29 }
 0x125   : > { %1387 = vmatmul.mubr.msk.bf16.vlgmr.msra.gmra.mrb[0].mxu0 %vm348_vm2, %v1465_v16 }
 0x126   : > { %1059 = vmatpush1.bf16.msra.mxu0 %v1045_v19  ;;  %1090 = vmatprep.mubr.bf16.mxu0 %v1478_v2 }
 0x127   : > { %1168 = vmatprep.subr.bf16.mxu0 %v1156_v18 }
 0x129   : > { %1363 = vmatmul.mubr.msk.bf16.vlgmr.msra.gmra.mrb[0].mxu1 %vm348_vm2, %v1466_v23 }
 0x12a   : > { %619 = vmatpush1.bf16.msra.mxu1 %v605_v24  ;;  %650 = vmatprep.mubr.bf16.mxu1 %v1478_v2 }
 0x131   : > { %1393 = vmatmul.mubr.msk.bf16.vlgmr.msra.gmra.mrb[0].mxu0 %vm348_vm2, %v1467_v30 }
 0x132   : > { %1169 = vmatpush1.bf16.msra.mxu0 %v1155_v31  ;;  %1200 = vmatprep.mubr.bf16.mxu0 %v1478_v2 }
 0x135   : > { %1369 = vmatmul.mubr.msk.bf16.vlgmr.msra.gmra.mrb[0].mxu1 %vm348_vm2, %v1468_v32 }
 0x13d   : > { %1399 = vmatmul.mubr.msk.bf16.vlgmr.msra.gmra.mrb[0].mxu0 %vm348_vm2, %v1469_v43 }
 0x208   : > { %v652_v33 = vpop.f32.mrb[0].mxu1 }
 0x209   : > { %v654_v34 = vpop.f32.mrb[1].mxu1 }
 0x20a   : > { %v656_v35 = vpop.f32.mrb[2].mxu1 }
 0x20b   : > { %v658_v37 = vpop.f32.mrb[3].mxu1 }
 0x210   : > { %v1202_v38 = vpop.f32.mrb[0].mxu0 }
 0x211   : > { %v1409_v39 = vadd.f32 %v1202_v38, %v652_v33  ;;  %v1204_v28 = vpop.f32.mrb[1].mxu0 }
 0x212   : > { %v1410_v40 = vadd.f32 %v1204_v28, %v654_v34  ;;  %v1206_v41 = vpop.f32.mrb[2].mxu0 }
 0x213   : > { %v1411_v2 = vadd.f32 %v1206_v41, %v656_v35  ;;  %v1208_v42 = vpop.f32.mrb[3].mxu0  ;;  %v1235_v44 = vmul.f32 %v1409_v39, %v1409_v39 }
 0x214   : > { %v1407_v45 = vpack.c.bf16 %v1410_v40, %v1409_v39  ;;  %v1412_v46 = vadd.f32 %v1208_v42, %v658_v37  ;;  %v1229_v47 = vadd.f32 %v1410_v40, %v1409_v39  ;;  %v1236_v48 = vmul.f32 %v1410_v40, %v1410_v40 }
 0x215   : > { %v1237_v49 = vmul.f32 %v1411_v2, %v1411_v2 }
 0x216   : > { %1227 = vst [vmem:[%s232_s30] sm:$0xff] %v1407_v45  ;;  %v1408_v27 = vpack.c.bf16 %v1412_v46, %v1411_v2  ;;  %1230 = vadd.xlane.f32.xlu0 %v1229_v47  ;;  %v1232_v50 = vadd.f32 %v1412_v46, %v1411_v2  ;;  %v1239_v51 = vadd.f32 %v1236_v48, %v1235_v44 }
 0x217   : > { %v1238_v52 = vmul.f32 %v1412_v46, %v1412_v46 }
 0x218   : > { %1228 = vst [vmem:[%s232_s30 + $0x8] sm:$0xff] %v1408_v27  ;;  %1233 = vadd.xlane.f32.xlu1 %v1232_v50 }
 0x219   : > { %v1242_v53 = vadd.f32 %v1238_v52, %v1237_v49 }
 0x21a   : > { %1240 = vadd.xlane.f32.xlu0 %v1239_v51 }
 0x21e   : > { %1243 = vadd.xlane.f32.xlu0 %v1242_v53 }
 0x2a3   : > { %v1231_v54 = vpop.xlane.xlu0 %1230 }
 0x2a5   : > { %v1234_v57 = vpop.xlane.xlu1 %1233 }
 0x2a7   : > { %v1241_v55 = vpop.xlane.xlu0 %1240 }
 0x2a8   : > { %v1245_v56 = vsel %vm669_vm0, %v1231_v54, %v1241_v55 }
 0x2a9   : > { %1248 = vst.msk [vmem:[%s237_s8] sm:$0xff] %vm1247_vm8, %v1245_v56 }
 0x2ab   : > { %v1244_v58 = vpop.xlane.xlu0 %1243 }
 0x2ac   : > { %v1246_v59 = vsel %vm669_vm0, %v1234_v57, %v1244_v58 }
 0x2ad   : > { %1249 = vst.msk [vmem:[%s237_s8 + $0x8] sm:$0xff] %vm1247_vm8, %v1246_v59 }
 0x2ae PF: > { %s16_s18 = sadd.s32 1, %s1476_s18  }
 0x2af   : > { %p13_p4 = scmp.ge.s32.totalorder %s16_s18, 4  }
 0x2b1   :  { %15 = sbr.rel (!%p13_p4) target bundleno = 1 (0x1), region = 94 }

// kernel: resnext_block_forward.7
= control target key start
LH: loop header
LB: loop body
LE: loop exit
PB: predicated region body
PF: predicated region fallthrough
CT: control target
= control target key end

     0   :  { %s524_s15 = smov 0   ;;  %s611_s0 = inlined_call_operand.vmem [shape: f32[2,32,256], index: 0, kind: input, shape index: {}]   ;;  %s612_s1 = inlined_call_operand.vmem [shape: f32[2,32,1], index: 1, kind: input, shape index: {}]   ;;  %s613_s2 = inlined_call_operand.vmem [shape: f32[2,32,256], index: 2, kind: input, shape index: {}]   ;;  %s614_s3 = inlined_call_operand.vmem [shape: f32[2,32,1], index: 3, kind: input, shape index: {}]   ;;  %s615_s4 = inlined_call_operand.vmem [shape: f32[2,32,256], index: 4, kind: output, shape index: {}]  }
   0x1 LB: > { %s455_s16 = sadd.s32 4294967295, %s496_s15   ;;  %p459_p0 = scmp.ge.s32.totalorder %s496_s15, 1  ;;  %s496_s15 = sphi %s524_s15, %s14_s15  }
   0x2   : > { %p172_p1 = scmp.lt.s32.totalorder %s496_s15, 3 }
   0x4   : > { %p173_p2 = pnand %p459_p0, %p172_p1 }
   0x5   : > { %v228_v0 = vld [vmem:[%s612_s1 + $0x10] sm:$0xff] (!%p173_p2)  ;;  %v226_v1 = vld [vmem:[%s612_s1] sm:$0xff] (!%p173_p2)  ;;  %v498_v2 = vmov (!%p173_p2), 0   ;;  %v229_v3 = vld [vmem:[%s612_s1 + $0x18] sm:$0xff] (!%p173_p2)  ;;  %p203_p3 = scmp.lt.s32.totalorder (!%p173_p2), %s455_s16, 1 }
   0x6   : > { %176 = sbr.rel (%p173_p2) target bundleno = 172 (0xac), region = 36  ;;  %489 = vset.pattern.permute.xlu1 (!%p173_p2), %v498_v2  ;;  %488 = vset.pattern.permute.xlu0 (!%p173_p2), %v498_v2  ;;  %v227_v4 = vld [vmem:[%s612_s1 + $0x8] sm:$0xff] (!%p173_p2)  ;;  %v299_v6 = vld [vmem:[%s614_s3] sm:$0xff] (!%p173_p2)  ;;  %v302_v7 = vld [vmem:[%s614_s3 + $0x18] sm:$0xff] (!%p173_p2) }
   0x7   : > { %242 = vperm.xlu1 (!%p173_p2), %489, %v228_v0   ;;  %232 = vperm.xlu0 (!%p173_p2), %488, %v226_v1   ;;  %v300_v5 = vld [vmem:[%s614_s3 + $0x8] sm:$0xff] (!%p173_p2)  ;;  %v301_v8 = vld [vmem:[%s614_s3 + $0x10] sm:$0xff] (!%p173_p2)  ;;  %v466_v10 = vld [vmem:[%s612_s1 + $0x20] sm:$0xff] (!%p173_p2) }
   0x8   : > { %v467_v9 = vld [vmem:[%s612_s1 + $0x28] sm:$0xff] (!%p173_p2)  ;;  %v469_v11 = vld [vmem:[%s612_s1 + $0x38] sm:$0xff] (!%p173_p2)  ;;  %v468_v12 = vld [vmem:[%s612_s1 + $0x30] sm:$0xff] (!%p173_p2) }
   0x9   : > { %v471_v13 = vld [vmem:[%s614_s3 + $0x28] sm:$0xff] (!%p173_p2)  ;;  %v470_v14 = vld [vmem:[%s614_s3 + $0x20] sm:$0xff] (!%p173_p2)  ;;  %v473_v15 = vld [vmem:[%s614_s3 + $0x38] sm:$0xff] (!%p173_p2) }
   0xa   : > { %v472_v16 = vld [vmem:[%s614_s3 + $0x30] sm:$0xff] (!%p173_p2) }
   0xb   : > { %247 = vperm.xlu1 (!%p173_p2), %489, %v229_v3   ;;  %237 = vperm.xlu0 (!%p173_p2), %488, %v227_v4  }
   0xd   : > { %s617_s16 = smov (!%p203_p3, %s455_s16), 1 }
   0xe   : > { %s584_s25 = sshll.u32 %s617_s16, 6 }
   0xf   : > { %310 = vperm.xlu1 %489, %v300_v5   ;;  %305 = vperm.xlu0 %488, %v299_v6   ;;  %s207_s28 = scalar_lea.vmem %s611_s0, %s584_s25  ;;  %s594_s5 = scalar_lea.vmem %s613_s2, %s584_s25 }
  0x10   : > { %v222_v27 = vld [vmem:[%s207_s28 + $0x20] sm:$0xff]  ;;  %v223_v28 = vld [vmem:[%s207_s28 + $0x28] sm:$0xff]  ;;  %v224_v31 = vld [vmem:[%s207_s28 + $0x30] sm:$0xff]  ;;  %s217_s7 = scalar_lea.vmem %s615_s4, %s584_s25 }
  0x11   : > { %v218_v29 = vld [vmem:[%s207_s28] sm:$0xff]  ;;  %v219_v30 = vld [vmem:[%s207_s28 + $0x8] sm:$0xff]  ;;  %v225_v32 = vld [vmem:[%s207_s28 + $0x38] sm:$0xff] }
  0x12   : > { %v220_v33 = vld [vmem:[%s207_s28 + $0x10] sm:$0xff]  ;;  %v221_v34 = vld [vmem:[%s207_s28 + $0x18] sm:$0xff]  ;;  %v291_v37 = vld [vmem:[%s594_s5] sm:$0xff] }
  0x13   : > { %320 = vperm.xlu1 %489, %v302_v7   ;;  %315 = vperm.xlu0 %488, %v301_v8   ;;  %v293_v35 = vld [vmem:[%s594_s5 + $0x10] sm:$0xff]  ;;  %v294_v36 = vld [vmem:[%s594_s5 + $0x18] sm:$0xff]  ;;  %v292_v38 = vld [vmem:[%s594_s5 + $0x8] sm:$0xff] }
  0x14   : > { %v297_v49 = vld [vmem:[%s594_s5 + $0x30] sm:$0xff]  ;;  %v298_v54 = vld [vmem:[%s594_s5 + $0x38] sm:$0xff]  ;;  %v295_v55 = vld [vmem:[%s594_s5 + $0x20] sm:$0xff] }
  0x15   : > { %v296_v56 = vld [vmem:[%s594_s5 + $0x28] sm:$0xff] }
  0x17   : > { %270 = vperm.xlu1 %489, %v467_v9   ;;  %265 = vperm.xlu0 %488, %v466_v10  }
  0x1b   : > { %280 = vperm.xlu1 %489, %v469_v11   ;;  %275 = vperm.xlu0 %488, %v468_v12  }
  0x1f   : > { %343 = vperm.xlu1 %489, %v471_v13   ;;  %338 = vperm.xlu0 %488, %v470_v14  }
  0x23   : > { %353 = vperm.xlu1 %489, %v473_v15   ;;  %348 = vperm.xlu0 %488, %v472_v16  }
  0x86   : > { %v243_v17 = vpop.permute.xlu1 %242  ;;  %v233_v18 = vpop.permute.xlu0 %232 }
  0x87   : > { %v254_v41 = vmul.f32 %v243_v17, %v222_v27  ;;  %v255_v42 = vmul.f32 %v243_v17, %v223_v28  ;;  %v250_v43 = vmul.f32 %v233_v18, %v218_v29  ;;  %v251_v44 = vmul.f32 %v233_v18, %v219_v30 }
  0x8a   : > { %v248_v19 = vpop.permute.xlu1 %247  ;;  %v238_v20 = vpop.permute.xlu0 %237 }
  0x8b   : > { %v256_v45 = vmul.f32 %v248_v19, %v224_v31  ;;  %v257_v46 = vmul.f32 %v248_v19, %v225_v32  ;;  %v252_v47 = vmul.f32 %v238_v20, %v220_v33  ;;  %v253_v48 = vmul.f32 %v238_v20, %v221_v34 }
  0x8e   : > { %v311_v21 = vpop.permute.xlu1 %310  ;;  %v306_v22 = vpop.permute.xlu0 %305 }
  0x8f   : > { %v325_v50 = vmul.f32 %v311_v21, %v293_v35  ;;  %v326_v51 = vmul.f32 %v311_v21, %v294_v36  ;;  %v323_v52 = vmul.f32 %v306_v22, %v291_v37  ;;  %v324_v53 = vmul.f32 %v306_v22, %v292_v38 }
  0x92   : > { %v321_v23 = vpop.permute.xlu1 %320  ;;  %v316_v24 = vpop.permute.xlu0 %315 }
  0x93   : > { %v329_v3 = vmul.f32 %v321_v23, %v297_v49  ;;  %v330_v4 = vmul.f32 %v321_v23, %v298_v54  ;;  %v327_v5 = vmul.f32 %v316_v24, %v295_v55  ;;  %v328_v6 = vmul.f32 %v316_v24, %v296_v56 }
  0x96   : > { %v271_v25 = vpop.permute.xlu1 %270  ;;  %v266_v26 = vpop.permute.xlu0 %265 }
  0x97   : > { %v285_v57 = vadd.f32 %v271_v25, %v252_v47  ;;  %v286_v58 = vadd.f32 %v271_v25, %v253_v48  ;;  %v283_v59 = vadd.f32 %v266_v26, %v250_v43  ;;  %v284_v60 = vadd.f32 %v266_v26, %v251_v44 }
  0x9a   : > { %v281_v39 = vpop.permute.xlu1 %280  ;;  %v276_v40 = vpop.permute.xlu0 %275 }
  0x9b   : > { %v289_v11 = vadd.f32 %v281_v39, %v256_v45  ;;  %v290_v12 = vadd.f32 %v281_v39, %v257_v46  ;;  %v287_v13 = vadd.f32 %v276_v40, %v254_v41  ;;  %v288_v14 = vadd.f32 %v276_v40, %v255_v42 }
  0x9e   : > { %v344_v61 = vpop.permute.xlu1 %343  ;;  %v339_v62 = vpop.permute.xlu0 %338 }
  0x9f   : > { %v358_v63 = vadd.f32 %v344_v61, %v325_v50  ;;  %v359_v0 = vadd.f32 %v344_v61, %v326_v51  ;;  %v356_v1 = vadd.f32 %v339_v62, %v323_v52  ;;  %v357_v2 = vadd.f32 %v339_v62, %v324_v53 }
  0xa1   : > { %v366_v7 = vadd.f32 %v358_v63, %v285_v57  ;;  %v367_v8 = vadd.f32 %v359_v0, %v286_v58  ;;  %v364_v9 = vadd.f32 %v356_v1, %v283_v59  ;;  %v365_v10 = vadd.f32 %v357_v2, %v284_v60 }
  0xa2   : > { %v354_v15 = vpop.permute.xlu1 %353  ;;  %v349_v16 = vpop.permute.xlu0 %348 }
  0xa3   : > { %v374_v17 = vmax.f32 %v366_v7, 0.0  ;;  %v375_v18 = vmax.f32 %v367_v8, 0.0  ;;  %v372_v19 = vmax.f32 %v364_v9, 0.0  ;;  %v373_v20 = vmax.f32 %v365_v10, 0.0 }
  0xa4   : > { %v362_v21 = vadd.f32 %v354_v15, %v329_v3  ;;  %v363_v22 = vadd.f32 %v354_v15, %v330_v4  ;;  %v360_v23 = vadd.f32 %v349_v16, %v327_v5  ;;  %v361_v24 = vadd.f32 %v349_v16, %v328_v6 }
  0xa5   : > { %382 = vst [vmem:[%s217_s7 + $0x10] sm:$0xff] %v374_v17  ;;  %383 = vst [vmem:[%s217_s7 + $0x18] sm:$0xff] %v375_v18 }
  0xa6   : > { %380 = vst [vmem:[%s217_s7] sm:$0xff] %v372_v19  ;;  %381 = vst [vmem:[%s217_s7 + $0x8] sm:$0xff] %v373_v20  ;;  %v370_v25 = vadd.f32 %v362_v21, %v289_v11  ;;  %v371_v26 = vadd.f32 %v363_v22, %v290_v12  ;;  %v368_v27 = vadd.f32 %v360_v23, %v287_v13 }
  0xa7   : > { %v369_v28 = vadd.f32 %v361_v24, %v288_v14 }
  0xa8   : > { %v378_v29 = vmax.f32 %v370_v25, 0.0  ;;  %v379_v30 = vmax.f32 %v371_v26, 0.0  ;;  %v376_v31 = vmax.f32 %v368_v27, 0.0 }
  0xa9   : > { %v377_v32 = vmax.f32 %v369_v28, 0.0 }
  0xaa   : > { %386 = vst [vmem:[%s217_s7 + $0x30] sm:$0xff] %v378_v29  ;;  %387 = vst [vmem:[%s217_s7 + $0x38] sm:$0xff] %v379_v30 }
  0xab   : > { %384 = vst [vmem:[%s217_s7 + $0x20] sm:$0xff] %v376_v31  ;;  %385 = vst [vmem:[%s217_s7 + $0x28] sm:$0xff] %v377_v32 }
  0xac PF: > { %s14_s15 = sadd.s32 1, %s496_s15  }
  0xad   : > { %p11_p4 = scmp.ge.s32.totalorder %s14_s15, 4  }
  0xaf   :  { %13 = sbr.rel (!%p11_p4) target bundleno = 1 (0x1), region = 71 }

</bundles_post_ra>
